<compile_context>
chip_gen: v7x
topology: tpu7x:2x2x1
jax: 0.10.0
libtpu: 0.0.40
codegen_flags: <defaults>
</compile_context>

<pallas_src>
import functools

import jax
import jax.numpy as jnp
from jax.experimental import pallas as pl
from jax.experimental.pallas import tpu as pltpu


def _round_up(x, m):
    return (x + m - 1) // m * m


def _scgen_vae_kernel(
    x_ref, eps_ref,
    w1_ref, b1_ref, w2_ref, b2_ref,
    wh_ref, bh_ref,                       # fused [wmu | wlv] head (lane-padded)
    wd1_ref, bd1_ref, wd2_ref, bd2_ref, wd3_ref, bd3_ref,
    recon_ref, stats_ref,
    *, latent_dim,
):
    cdt = w1_ref.dtype  # matmul operand dtype (bf16 on v6e/v7x; f32 also works)

    def dense(a, w_ref, b_ref, relu):
        # MXU matmul in cdt with f32 accumulation; bias/ReLU in f32 on the VPU.
        y = jnp.dot(a.astype(cdt), w_ref[...],
                    preferred_element_type=jnp.float32) + b_ref[...]
        if relu:
            y = jnp.maximum(y, 0.0)
        return y

    # ---- encoder: Linear -> ReLU -> Linear -> ReLU ----
    h = dense(x_ref[...], w1_ref, b1_ref, relu=True)
    h = dense(h, w2_ref, b2_ref, relu=True)

    # ---- fused latent heads: one matmul -> [mu | logvar | 0-pad] ----
    head = dense(h, wh_ref, bh_ref, relu=False)          # (tile_b, head_pad)
    mu = head[:, :latent_dim]
    logvar = head[:, latent_dim:2 * latent_dim]

    # ---- reparameterize (f32): z = mu + eps * exp(0.5 * logvar) ----
    z = mu + eps_ref[...] * jnp.exp(0.5 * logvar)

    # ---- decoder: (Linear -> ReLU) x3 ----
    d = dense(z, wd1_ref, bd1_ref, relu=True)
    d = dense(d, wd2_ref, bd2_ref, relu=True)
    d = dense(d, wd3_ref, bd3_ref, relu=True)

    recon_ref[...] = d.astype(recon_ref.dtype)
    stats_ref[...] = head.astype(stats_ref.dtype)        # lane-dense packed store


def init_params(key, input_dim, hidden_dim, latent_dim):
    """Deterministic init. Weights stored pre-transposed as (in_dim, out_dim)."""
    shapes = {
        "w1": (input_dim, hidden_dim), "b1": (1, hidden_dim),
        "w2": (hidden_dim, hidden_dim), "b2": (1, hidden_dim),
        "wmu": (hidden_dim, latent_dim), "bmu": (1, latent_dim),
        "wlv": (hidden_dim, latent_dim), "blv": (1, latent_dim),
        "wd1": (latent_dim, hidden_dim), "bd1": (1, hidden_dim),
        "wd2": (hidden_dim, hidden_dim), "bd2": (1, hidden_dim),
        "wd3": (hidden_dim, input_dim), "bd3": (1, input_dim),
    }
    params = {}
    keys = jax.random.split(key, len(shapes))
    for k, (name, shape) in zip(keys, shapes.items()):
        fan_in = shape[0] if name.startswith("w") else shapes["w" + name[1:]][0]
        bound = 1.0 / jnp.sqrt(fan_in)  # mimics nn.Linear default init range
        params[name] = jax.random.uniform(
            k, shape, jnp.float32, minval=-bound, maxval=bound)
    return params


def pack_params(params, compute_dtype=jnp.bfloat16):
    """Concatenate + lane-pad the mu/logvar heads; cast weights to compute dtype."""
    latent_dim = params["wmu"].shape[1]
    head_pad = _round_up(2 * latent_dim, 128)
    wh = jnp.concatenate([params["wmu"], params["wlv"]], axis=1)
    bh = jnp.concatenate([params["bmu"], params["blv"]], axis=1)
    wh = jnp.pad(wh, ((0, 0), (0, head_pad - 2 * latent_dim)))
    bh = jnp.pad(bh, ((0, 0), (0, head_pad - 2 * latent_dim)))

    packed = {}
    for name in ("w1", "w2", "wd1", "wd2", "wd3"):
        packed[name] = params[name].astype(compute_dtype)
    for name in ("b1", "b2", "bd1", "bd2", "bd3"):
        packed[name] = params[name].astype(jnp.float32)
    packed["wh"] = wh.astype(compute_dtype)
    packed["bh"] = bh.astype(jnp.float32)
    return packed


@functools.partial(jax.jit, static_argnames=("tile_b",))
def scgen_vae_forward(x, eps, packed, tile_b=128):
    """Fused SCGENVAE forward. x: (B, input_dim), eps: (B, latent_dim)."""
    B, input_dim = x.shape
    latent_dim = eps.shape[1]
    hidden_dim = packed["w1"].shape[1]
    head_pad = packed["wh"].shape[1]
    cdt = packed["w1"].dtype

    # Pad batch to a multiple of tile_b (padded tail rows are sliced off below).
    Bp = _round_up(B, tile_b)
    if Bp != B:
        x = jnp.pad(x, ((0, Bp - B), (0, 0)))
        eps = jnp.pad(eps, ((0, Bp - B), (0, 0)))
    x = x.astype(cdt)                     # bf16 input DMA halves HBM traffic
    grid = (Bp // tile_b,)

    def row_spec(feat):
        return pl.BlockSpec((tile_b, feat), lambda i: (i, 0))

    def resident_spec(shape):
        # Constant index_map: block never changes -> fetched once, reused.
        return pl.BlockSpec(shape, lambda i: (0, 0))

    weight_order = ["w1", "b1", "w2", "b2", "wh", "bh",
                    "wd1", "bd1", "wd2", "bd2", "wd3", "bd3"]
    weight_args = [packed[k] for k in weight_order]

    in_specs = [row_spec(input_dim), row_spec(latent_dim)]
    in_specs += [resident_spec(tuple(w.shape)) for w in weight_args]
    out_specs = [row_spec(input_dim), row_spec(head_pad)]
    out_shape = (
        jax.ShapeDtypeStruct((Bp, input_dim), jnp.float32),
        jax.ShapeDtypeStruct((Bp, head_pad), jnp.float32),
    )

    # Size the scoped VMEM limit from the actual footprint (never below default).
    itemsize = lambda a: jnp.dtype(a.dtype).itemsize
    weight_bytes = sum(int(a.size) * itemsize(a) for a in weight_args)
    io_bytes = tile_b * (input_dim * itemsize(x) + latent_dim * 4
                         + input_dim * 4 + head_pad * 4)
    vmem_limit = int(min(max(2 * (weight_bytes + io_bytes) + (8 << 20), 32 << 20),
                         128 << 20))

    # Scheduler hint for XLA around the custom call.
    matmul_flops = 2 * Bp * (
        input_dim * hidden_dim + hidden_dim * hidden_dim + hidden_dim * head_pad
        + latent_dim * hidden_dim + hidden_dim * hidden_dim + hidden_dim * input_dim)
    bytes_accessed = (int(x.size) * itemsize(x) + int(eps.size) * 4
                      + weight_bytes + Bp * (input_dim + head_pad) * 4)
    cost = pl.CostEstimate(flops=matmul_flops,
                           transcendentals=Bp * latent_dim,
                           bytes_accessed=bytes_accessed)

    kernel = functools.partial(_scgen_vae_kernel, latent_dim=latent_dim)

    recon_p, stats_p = pl.pallas_call(
        kernel,
        out_shape=out_shape,
        grid_spec=pltpu.PrefetchScalarGridSpec(
            num_scalar_prefetch=0,
            grid=grid,
            in_specs=in_specs,
            out_specs=out_specs,
        ),
        compiler_params=pltpu.CompilerParams(
            dimension_semantics=("parallel",),
            vmem_limit_bytes=vmem_limit,
        ),
        cost_estimate=cost,
    )(x, eps, *weight_args)

    recon = recon_p[:B]
    mu = stats_p[:B, :latent_dim]
    logvar = stats_p[:B, latent_dim:2 * latent_dim]
    return recon, mu, logvar


def reference_forward(x, eps, p, compute_dtype=jnp.bfloat16):
    """Pure-JAX reference matching the PyTorch forward (same matmul dtype)."""
    cdt = compute_dtype

    def dense(a, w, b, relu):
        y = jnp.dot(a.astype(cdt), w.astype(cdt),
                    preferred_element_type=jnp.float32) + b
        return jnp.maximum(y, 0.0) if relu else y

    h = dense(x, p["w1"], p["b1"], True)
    h = dense(h, p["w2"], p["b2"], True)
    mu = dense(h, p["wmu"], p["bmu"], False)
    logvar = dense(h, p["wlv"], p["blv"], False)
    z = mu + eps * jnp.exp(0.5 * logvar)
    d = dense(z, p["wd1"], p["bd1"], True)
    d = dense(d, p["wd2"], p["bd2"], True)
    d = dense(d, p["wd3"], p["bd3"], True)
    return d, mu, logvar


if __name__ == "__main__":
    # Small shapes consistent with the module's MLP structure.
    # B=200 exercises the batch-padding path (tile_b=128 -> padded to 256, grid=2).
    B, INPUT_DIM, HIDDEN_DIM, LATENT_DIM = 200, 256, 128, 64
    TILE_B = 128

    key = jax.random.PRNGKey(0)
    kx, keps, kp = jax.random.split(key, 3)

    x = jax.random.normal(kx, (B, INPUT_DIM), jnp.float32)
    eps = jax.random.normal(keps, (B, LATENT_DIM), jnp.float32)  # torch.randn_like
    params = init_params(kp, INPUT_DIM, HIDDEN_DIM, LATENT_DIM)
    packed = pack_params(params, compute_dtype=jnp.bfloat16)

    recon, mu, logvar = scgen_vae_forward(x, eps, packed, tile_b=TILE_B)
    jax.block_until_ready((recon, mu, logvar))

    recon_ref, mu_ref, logvar_ref = reference_forward(x, eps, params)
    assert recon.shape == (B, INPUT_DIM)
    assert mu.shape == (B, LATENT_DIM) and logvar.shape == (B, LATENT_DIM)
    assert jnp.allclose(recon, recon_ref, atol=1e-2, rtol=1e-2)
    assert jnp.allclose(mu, mu_ref, atol=1e-2, rtol=1e-2)
    assert jnp.allclose(logvar, logvar_ref, atol=1e-2, rtol=1e-2)

    print("KERNEL_OK")
</pallas_src>

<mosaic_0001>
module attributes {stable_mosaic.version = 11 : i64} {
  func.func @_scgen_vae_kernel(%arg0: i32, %arg1: memref<128x256xbf16, #tpu.memory_space<vmem>>, %arg2: memref<128x64xf32, #tpu.memory_space<vmem>>, %arg3: memref<256x128xbf16, #tpu.memory_space<vmem>>, %arg4: memref<1x128xf32, #tpu.memory_space<vmem>>, %arg5: memref<128x128xbf16, #tpu.memory_space<vmem>>, %arg6: memref<1x128xf32, #tpu.memory_space<vmem>>, %arg7: memref<128x128xbf16, #tpu.memory_space<vmem>>, %arg8: memref<1x128xf32, #tpu.memory_space<vmem>>, %arg9: memref<64x128xbf16, #tpu.memory_space<vmem>>, %arg10: memref<1x128xf32, #tpu.memory_space<vmem>>, %arg11: memref<128x128xbf16, #tpu.memory_space<vmem>>, %arg12: memref<1x128xf32, #tpu.memory_space<vmem>>, %arg13: memref<128x256xbf16, #tpu.memory_space<vmem>>, %arg14: memref<1x256xf32, #tpu.memory_space<vmem>>, %arg15: memref<128x256xf32, #tpu.memory_space<vmem>>, %arg16: memref<128x128xf32, #tpu.memory_space<vmem>>) attributes {dimension_semantics = [#tpu.dimension_semantics<parallel>], iteration_bounds = array<i64: 2>, scalar_prefetch = 0 : i64, scratch_operands = 0 : i64, tpu.core_type = #tpu.core_type<tc>, window_params = [{transform_indices = @transform_0, window_bounds = array<i64: 128, 256>}, {transform_indices = @transform_1, window_bounds = array<i64: 128, 64>}, {pipeline_mode = #tpu.pipeline_mode<synchronous>, transform_indices = @transform_2, window_bounds = array<i64: 256, 128>}, {pipeline_mode = #tpu.pipeline_mode<synchronous>, transform_indices = @transform_3, window_bounds = array<i64: 1, 128>}, {pipeline_mode = #tpu.pipeline_mode<synchronous>, transform_indices = @transform_4, window_bounds = array<i64: 128, 128>}, {pipeline_mode = #tpu.pipeline_mode<synchronous>, transform_indices = @transform_5, window_bounds = array<i64: 1, 128>}, {pipeline_mode = #tpu.pipeline_mode<synchronous>, transform_indices = @transform_6, window_bounds = array<i64: 128, 128>}, {pipeline_mode = #tpu.pipeline_mode<synchronous>, transform_indices = @transform_7, window_bounds = array<i64: 1, 128>}, {pipeline_mode = #tpu.pipeline_mode<synchronous>, transform_indices = @transform_8, window_bounds = array<i64: 64, 128>}, {pipeline_mode = #tpu.pipeline_mode<synchronous>, transform_indices = @transform_9, window_bounds = array<i64: 1, 128>}, {pipeline_mode = #tpu.pipeline_mode<synchronous>, transform_indices = @transform_10, window_bounds = array<i64: 128, 128>}, {pipeline_mode = #tpu.pipeline_mode<synchronous>, transform_indices = @transform_11, window_bounds = array<i64: 1, 128>}, {pipeline_mode = #tpu.pipeline_mode<synchronous>, transform_indices = @transform_12, window_bounds = array<i64: 128, 256>}, {pipeline_mode = #tpu.pipeline_mode<synchronous>, transform_indices = @transform_13, window_bounds = array<i64: 1, 256>}, {transform_indices = @transform_14, window_bounds = array<i64: 128, 256>}, {transform_indices = @transform_15, window_bounds = array<i64: 128, 128>}]} {
    %c0 = arith.constant 0 : index
    %c0_0 = arith.constant 0 : index
    %0 = vector.load %arg1[%c0, %c0_0] : memref<128x256xbf16, #tpu.memory_space<vmem>>, vector<128x256xbf16>
    %c0_1 = arith.constant 0 : index
    %c0_2 = arith.constant 0 : index
    %1 = vector.load %arg3[%c0_1, %c0_2] : memref<256x128xbf16, #tpu.memory_space<vmem>>, vector<256x128xbf16>
    %cst = arith.constant dense<0.000000e+00> : vector<128x128xf32>
    %2 = tpu.matmul %0, %1, %cst {dimension_numbers = #tpu.dot_dimension_numbers<[1], [0], [0], [1], [0, 0, 1, 1], [], []>} : vector<128x256xbf16>, vector<256x128xbf16>, vector<128x128xf32> -> vector<128x128xf32>
    %c0_3 = arith.constant 0 : index
    %c0_4 = arith.constant 0 : index
    %3 = vector.load %arg4[%c0_3, %c0_4] : memref<1x128xf32, #tpu.memory_space<vmem>>, vector<1x128xf32>
    %4 = vector.broadcast %3 : vector<1x128xf32> to vector<128x128xf32>
    %5 = arith.addf %2, %4 : vector<128x128xf32>
    %cst_5 = arith.constant 0.000000e+00 : f32
    %6 = vector.broadcast %cst_5 : f32 to vector<128x128xf32>
    %7 = arith.maximumf %5, %6 : vector<128x128xf32>
    %8 = arith.truncf %7 : vector<128x128xf32> to vector<128x128xbf16>
    %c0_6 = arith.constant 0 : index
    %c0_7 = arith.constant 0 : index
    %9 = vector.load %arg5[%c0_6, %c0_7] : memref<128x128xbf16, #tpu.memory_space<vmem>>, vector<128x128xbf16>
    %cst_8 = arith.constant dense<0.000000e+00> : vector<128x128xf32>
    %10 = tpu.matmul %8, %9, %cst_8 {dimension_numbers = #tpu.dot_dimension_numbers<[1], [0], [0], [1], [0, 0, 1, 1], [], []>} : vector<128x128xbf16>, vector<128x128xbf16>, vector<128x128xf32> -> vector<128x128xf32>
    %c0_9 = arith.constant 0 : index
    %c0_10 = arith.constant 0 : index
    %11 = vector.load %arg6[%c0_9, %c0_10] : memref<1x128xf32, #tpu.memory_space<vmem>>, vector<1x128xf32>
    %12 = vector.broadcast %11 : vector<1x128xf32> to vector<128x128xf32>
    %13 = arith.addf %10, %12 : vector<128x128xf32>
    %cst_11 = arith.constant 0.000000e+00 : f32
    %14 = vector.broadcast %cst_11 : f32 to vector<128x128xf32>
    %15 = arith.maximumf %13, %14 : vector<128x128xf32>
    %16 = arith.truncf %15 : vector<128x128xf32> to vector<128x128xbf16>
    %c0_12 = arith.constant 0 : index
    %c0_13 = arith.constant 0 : index
    %17 = vector.load %arg7[%c0_12, %c0_13] : memref<128x128xbf16, #tpu.memory_space<vmem>>, vector<128x128xbf16>
    %cst_14 = arith.constant dense<0.000000e+00> : vector<128x128xf32>
    %18 = tpu.matmul %16, %17, %cst_14 {dimension_numbers = #tpu.dot_dimension_numbers<[1], [0], [0], [1], [0, 0, 1, 1], [], []>} : vector<128x128xbf16>, vector<128x128xbf16>, vector<128x128xf32> -> vector<128x128xf32>
    %c0_15 = arith.constant 0 : index
    %c0_16 = arith.constant 0 : index
    %19 = vector.load %arg8[%c0_15, %c0_16] : memref<1x128xf32, #tpu.memory_space<vmem>>, vector<1x128xf32>
    %20 = vector.broadcast %19 : vector<1x128xf32> to vector<128x128xf32>
    %21 = arith.addf %18, %20 : vector<128x128xf32>
    %22 = vector.extract_strided_slice %21 {offsets = [0, 0], sizes = [128, 64], strides = [1, 1]} : vector<128x128xf32> to vector<128x64xf32>
    %23 = vector.extract_strided_slice %21 {offsets = [0, 64], sizes = [128, 64], strides = [1, 1]} : vector<128x128xf32> to vector<128x64xf32>
    %c0_17 = arith.constant 0 : index
    %c0_18 = arith.constant 0 : index
    %24 = vector.load %arg2[%c0_17, %c0_18] : memref<128x64xf32, #tpu.memory_space<vmem>>, vector<128x64xf32>
    %cst_19 = arith.constant 5.000000e-01 : f32
    %25 = vector.broadcast %cst_19 : f32 to vector<128x64xf32>
    %26 = arith.mulf %25, %23 : vector<128x64xf32>
    %27 = math.exp %26 : vector<128x64xf32>
    %28 = arith.mulf %24, %27 : vector<128x64xf32>
    %29 = arith.addf %22, %28 : vector<128x64xf32>
    %30 = arith.truncf %29 : vector<128x64xf32> to vector<128x64xbf16>
    %c0_20 = arith.constant 0 : index
    %c0_21 = arith.constant 0 : index
    %31 = vector.load %arg9[%c0_20, %c0_21] : memref<64x128xbf16, #tpu.memory_space<vmem>>, vector<64x128xbf16>
    %cst_22 = arith.constant dense<0.000000e+00> : vector<128x128xf32>
    %32 = tpu.matmul %30, %31, %cst_22 {dimension_numbers = #tpu.dot_dimension_numbers<[1], [0], [0], [1], [0, 0, 1, 1], [], []>} : vector<128x64xbf16>, vector<64x128xbf16>, vector<128x128xf32> -> vector<128x128xf32>
    %c0_23 = arith.constant 0 : index
    %c0_24 = arith.constant 0 : index
    %33 = vector.load %arg10[%c0_23, %c0_24] : memref<1x128xf32, #tpu.memory_space<vmem>>, vector<1x128xf32>
    %34 = vector.broadcast %33 : vector<1x128xf32> to vector<128x128xf32>
    %35 = arith.addf %32, %34 : vector<128x128xf32>
    %cst_25 = arith.constant 0.000000e+00 : f32
    %36 = vector.broadcast %cst_25 : f32 to vector<128x128xf32>
    %37 = arith.maximumf %35, %36 : vector<128x128xf32>
    %38 = arith.truncf %37 : vector<128x128xf32> to vector<128x128xbf16>
    %c0_26 = arith.constant 0 : index
    %c0_27 = arith.constant 0 : index
    %39 = vector.load %arg11[%c0_26, %c0_27] : memref<128x128xbf16, #tpu.memory_space<vmem>>, vector<128x128xbf16>
    %cst_28 = arith.constant dense<0.000000e+00> : vector<128x128xf32>
    %40 = tpu.matmul %38, %39, %cst_28 {dimension_numbers = #tpu.dot_dimension_numbers<[1], [0], [0], [1], [0, 0, 1, 1], [], []>} : vector<128x128xbf16>, vector<128x128xbf16>, vector<128x128xf32> -> vector<128x128xf32>
    %c0_29 = arith.constant 0 : index
    %c0_30 = arith.constant 0 : index
    %41 = vector.load %arg12[%c0_29, %c0_30] : memref<1x128xf32, #tpu.memory_space<vmem>>, vector<1x128xf32>
    %42 = vector.broadcast %41 : vector<1x128xf32> to vector<128x128xf32>
    %43 = arith.addf %40, %42 : vector<128x128xf32>
    %cst_31 = arith.constant 0.000000e+00 : f32
    %44 = vector.broadcast %cst_31 : f32 to vector<128x128xf32>
    %45 = arith.maximumf %43, %44 : vector<128x128xf32>
    %46 = arith.truncf %45 : vector<128x128xf32> to vector<128x128xbf16>
    %c0_32 = arith.constant 0 : index
    %c0_33 = arith.constant 0 : index
    %47 = vector.load %arg13[%c0_32, %c0_33] : memref<128x256xbf16, #tpu.memory_space<vmem>>, vector<128x256xbf16>
    %cst_34 = arith.constant dense<0.000000e+00> : vector<128x256xf32>
    %48 = tpu.matmul %46, %47, %cst_34 {dimension_numbers = #tpu.dot_dimension_numbers<[1], [0], [0], [1], [0, 0, 1, 1], [], []>} : vector<128x128xbf16>, vector<128x256xbf16>, vector<128x256xf32> -> vector<128x256xf32>
    %c0_35 = arith.constant 0 : index
    %c0_36 = arith.constant 0 : index
    %49 = vector.load %arg14[%c0_35, %c0_36] : memref<1x256xf32, #tpu.memory_space<vmem>>, vector<1x256xf32>
    %50 = vector.broadcast %49 : vector<1x256xf32> to vector<128x256xf32>
    %51 = arith.addf %48, %50 : vector<128x256xf32>
    %cst_37 = arith.constant 0.000000e+00 : f32
    %52 = vector.broadcast %cst_37 : f32 to vector<128x256xf32>
    %53 = arith.maximumf %51, %52 : vector<128x256xf32>
    %c0_38 = arith.constant 0 : index
    %c0_39 = arith.constant 0 : index
    %54 = vector.load %arg15[%c0_38, %c0_39] : memref<128x256xf32, #tpu.memory_space<vmem>>, vector<128x256xf32>
    tpu.vector_store %arg15[%c0_38, %c0_39], %53 {strides = array<i32>} : memref<128x256xf32, #tpu.memory_space<vmem>>, vector<128x256xf32>,
    %c0_40 = arith.constant 0 : index
    %c0_41 = arith.constant 0 : index
    %55 = vector.load %arg16[%c0_40, %c0_41] : memref<128x128xf32, #tpu.memory_space<vmem>>, vector<128x128xf32>
    tpu.vector_store %arg16[%c0_40, %c0_41], %21 {strides = array<i32>} : memref<128x128xf32, #tpu.memory_space<vmem>>, vector<128x128xf32>,
    return
  }
  func.func @transform_0(%arg0: i32) -> (i32, i32) {
    %c0_i32 = arith.constant 0 : i32
    %c0_i32_0 = arith.constant 0 : i32
    return %arg0, %c0_i32 : i32, i32
  }
  func.func @transform_1(%arg0: i32) -> (i32, i32) {
    %c0_i32 = arith.constant 0 : i32
    %c0_i32_0 = arith.constant 0 : i32
    return %arg0, %c0_i32 : i32, i32
  }
  func.func @transform_2(%arg0: i32) -> (i32, i32) {
    %c0_i32 = arith.constant 0 : i32
    %c0_i32_0 = arith.constant 0 : i32
    %c0_i32_1 = arith.constant 0 : i32
    return %c0_i32, %c0_i32_0 : i32, i32
  }
  func.func @transform_3(%arg0: i32) -> (i32, i32) {
    %c0_i32 = arith.constant 0 : i32
    %c0_i32_0 = arith.constant 0 : i32
    %c0_i32_1 = arith.constant 0 : i32
    return %c0_i32, %c0_i32_0 : i32, i32
  }
  func.func @transform_4(%arg0: i32) -> (i32, i32) {
    %c0_i32 = arith.constant 0 : i32
    %c0_i32_0 = arith.constant 0 : i32
    %c0_i32_1 = arith.constant 0 : i32
    return %c0_i32, %c0_i32_0 : i32, i32
  }
  func.func @transform_5(%arg0: i32) -> (i32, i32) {
    %c0_i32 = arith.constant 0 : i32
    %c0_i32_0 = arith.constant 0 : i32
    %c0_i32_1 = arith.constant 0 : i32
    return %c0_i32, %c0_i32_0 : i32, i32
  }
  func.func @transform_6(%arg0: i32) -> (i32, i32) {
    %c0_i32 = arith.constant 0 : i32
    %c0_i32_0 = arith.constant 0 : i32
    %c0_i32_1 = arith.constant 0 : i32
    return %c0_i32, %c0_i32_0 : i32, i32
  }
  func.func @transform_7(%arg0: i32) -> (i32, i32) {
    %c0_i32 = arith.constant 0 : i32
    %c0_i32_0 = arith.constant 0 : i32
    %c0_i32_1 = arith.constant 0 : i32
    return %c0_i32, %c0_i32_0 : i32, i32
  }
  func.func @transform_8(%arg0: i32) -> (i32, i32) {
    %c0_i32 = arith.constant 0 : i32
    %c0_i32_0 = arith.constant 0 : i32
    %c0_i32_1 = arith.constant 0 : i32
    return %c0_i32, %c0_i32_0 : i32, i32
  }
  func.func @transform_9(%arg0: i32) -> (i32, i32) {
    %c0_i32 = arith.constant 0 : i32
    %c0_i32_0 = arith.constant 0 : i32
    %c0_i32_1 = arith.constant 0 : i32
    return %c0_i32, %c0_i32_0 : i32, i32
  }
  func.func @transform_10(%arg0: i32) -> (i32, i32) {
    %c0_i32 = arith.constant 0 : i32
    %c0_i32_0 = arith.constant 0 : i32
    %c0_i32_1 = arith.constant 0 : i32
    return %c0_i32, %c0_i32_0 : i32, i32
  }
  func.func @transform_11(%arg0: i32) -> (i32, i32) {
    %c0_i32 = arith.constant 0 : i32
    %c0_i32_0 = arith.constant 0 : i32
    %c0_i32_1 = arith.constant 0 : i32
    return %c0_i32, %c0_i32_0 : i32, i32
  }
  func.func @transform_12(%arg0: i32) -> (i32, i32) {
    %c0_i32 = arith.constant 0 : i32
    %c0_i32_0 = arith.constant 0 : i32
    %c0_i32_1 = arith.constant 0 : i32
    return %c0_i32, %c0_i32_0 : i32, i32
  }
  func.func @transform_13(%arg0: i32) -> (i32, i32) {
    %c0_i32 = arith.constant 0 : i32
    %c0_i32_0 = arith.constant 0 : i32
    %c0_i32_1 = arith.constant 0 : i32
    return %c0_i32, %c0_i32_0 : i32, i32
  }
  func.func @transform_14(%arg0: i32) -> (i32, i32) {
    %c0_i32 = arith.constant 0 : i32
    %c0_i32_0 = arith.constant 0 : i32
    return %arg0, %c0_i32 : i32, i32
  }
  func.func @transform_15(%arg0: i32) -> (i32, i32) {
    %c0_i32 = arith.constant 0 : i32
    %c0_i32_0 = arith.constant 0 : i32
    return %arg0, %c0_i32 : i32, i32
  }
}

</mosaic_0001>

<bundles_post_ra>
// kernel: scgen_vae_forward.1
= control target key start
LH: loop header
LB: loop body
LE: loop exit
PB: predicated region body
PF: predicated region fallthrough
CT: control target
= control target key end

     0   :  { %s2794_s18 = smov 0   ;;  %s3303_s0 = inlined_call_operand.vmem [shape: bf16[256,256], index: 0, kind: input, shape index: {}]   ;;  %s3304_s1 = inlined_call_operand.vmem [shape: f32[256,64], index: 1, kind: input, shape index: {}]   ;;  %s3305_s2 = inlined_call_operand.vmem [shape: bf16[256,128], index: 2, kind: input, shape index: {}]   ;;  %s3306_s3 = inlined_call_operand.vmem [shape: f32[1,128], index: 3, kind: input, shape index: {}]   ;;  %s3307_s4 = inlined_call_operand.vmem [shape: bf16[128,128], index: 4, kind: input, shape index: {}]   ;;  %s3308_s5 = inlined_call_operand.vmem [shape: f32[1,128], index: 5, kind: input, shape index: {}]   ;;  %s3309_s6 = inlined_call_operand.vmem [shape: bf16[128,128], index: 6, kind: input, shape index: {}]   ;;  %s3310_s7 = inlined_call_operand.vmem [shape: f32[1,128], index: 7, kind: input, shape index: {}]   ;;  %s3311_s8 = inlined_call_operand.vmem [shape: bf16[64,128], index: 8, kind: input, shape index: {}]   ;;  %s3312_s9 = inlined_call_operand.vmem [shape: f32[1,128], index: 9, kind: input, shape index: {}]   ;;  %s3313_s10 = inlined_call_operand.vmem [shape: bf16[128,128], index: 10, kind: input, shape index: {}]   ;;  %s3314_s11 = inlined_call_operand.vmem [shape: f32[1,128], index: 11, kind: input, shape index: {}]   ;;  %s3315_s12 = inlined_call_operand.vmem [shape: bf16[128,256], index: 12, kind: input, shape index: {}]   ;;  %s3316_s13 = inlined_call_operand.vmem [shape: f32[1,256], index: 13, kind: input, shape index: {}]   ;;  %s3317_s14 = inlined_call_operand.vmem [shape: f32[256,256], index: 14, kind: output, shape index: {0}]   ;;  %s3318_s15 = inlined_call_operand.vmem [shape: f32[256,128], index: 15, kind: output, shape index: {1}]  }
   0x1 LB: > { %s2202_s19 = sadd.s32 4294967295, %s2710_s18   ;;  %p2206_p0 = scmp.ge.s32.totalorder %s2710_s18, 1  ;;  %s2710_s18 = sphi %s2794_s18, %s26_s18  }
   0x2   : > { %p453_p1 = scmp.lt.s32.totalorder %s2710_s18, 3 }
   0x4   : > { %p454_p2 = pnand %p2206_p0, %p453_p1 }
   0x5   : > { %v2580_v0 = vld [vmem:[%s3305_s2 + $0x40] sm:$0xff] (!%p454_p2)   ;;  %s2207_s22 = sshll.u32 (!%p454_p2), %s2202_s19, 4  ;;  %v2582_v2 = vld [vmem:[%s3305_s2 + $0x48] sm:$0xff] (!%p454_p2)   ;;  %v2584_v4 = vld [vmem:[%s3305_s2 + $0x50] sm:$0xff] (!%p454_p2)   ;;  %s2712_s20 = smov (!%p454_p2), 64   ;;  %vm1459_vm0 = vcmask (!%p454_p2), 523264  }
   0x6   : > { %457 = sbr.rel (%p454_p2) target bundleno = 1567 (0x61f), region = 76  ;;  %v2581_v1 = vld [vmem:[%s3305_s2] sm:$0xff] (!%p454_p2)   ;;  %2310 = vmatprep.subr.bf16.mxu0 (!%p454_p2), %v2580_v0  ;;  %2554 = vmatprep.subr.bf16.mxu1 (!%p454_p2), %v2580_v0  ;;  %v2583_v3 = vld [vmem:[%s3305_s2 + $0x8] sm:$0xff] (!%p454_p2)   ;;  %p514_p3 = scmp.lt.s32.totalorder (!%p454_p2), %s2207_s22, 31  ;;  %v2585_v5 = vld [vmem:[%s3305_s2 + $0x10] sm:$0xff] (!%p454_p2)  }
   0x7   : > { %2311 = vmatpush3.bf16.msra.mxu0 (!%p454_p2), %v2581_v1  ;;  %2562 = vmatpush3.bf16.msra.mxu1 (!%p454_p2), %v2581_v1  ;;  %v2586_v6 = vld [vmem:[%s3305_s2 + $0x58] sm:$0xff] (!%p454_p2)   ;;  %v2588_v8 = vld [vmem:[%s3305_s2 + $0x60] sm:$0xff] (!%p454_p2)   ;;  %v2590_v10 = vld [vmem:[%s3305_s2 + $0x68] sm:$0xff] (!%p454_p2)  }
   0x8   : > { %2312 = vmatprep.subr.bf16.mxu0 (!%p454_p2), %v2582_v2  ;;  %2555 = vmatprep.subr.bf16.mxu1 (!%p454_p2), %v2582_v2  ;;  %v2587_v7 = vld [vmem:[%s3305_s2 + $0x18] sm:$0xff] (!%p454_p2)   ;;  %v2589_v9 = vld [vmem:[%s3305_s2 + $0x20] sm:$0xff] (!%p454_p2)   ;;  %v2591_v12 = vld [vmem:[%s3305_s2 + $0x28] sm:$0xff] (!%p454_p2)  }
   0x9   : > { %v2592_v13 = vld [vmem:[%s3305_s2 + $0x70] sm:$0xff] (!%p454_p2)   ;;  %v2594_v16 = vld [vmem:[%s3305_s2 + $0x78] sm:$0xff] (!%p454_p2)   ;;  %v2620_v21 = vld [vmem:[%s3307_s4] sm:$0xff] (!%p454_p2)  }
   0xa   : > { %v2593_v15 = vld [vmem:[%s3305_s2 + $0x30] sm:$0xff] (!%p454_p2)   ;;  %v2595_v17 = vld [vmem:[%s3305_s2 + $0x38] sm:$0xff] (!%p454_p2)   ;;  %v2621_v23 = vld [vmem:[%s3307_s4 + $0x8] sm:$0xff] (!%p454_p2)  }
   0xb   : > { %2313 = vmatpush3.bf16.msra.mxu0 (!%p454_p2), %v2583_v3  ;;  %2563 = vmatpush3.bf16.msra.mxu1 (!%p454_p2), %v2583_v3  ;;  %v2622_v24 = vld [vmem:[%s3307_s4 + $0x10] sm:$0xff] (!%p454_p2)   ;;  %v2623_v35 = vld [vmem:[%s3307_s4 + $0x18] sm:$0xff] (!%p454_p2)   ;;  %v2624_v36 = vld [vmem:[%s3307_s4 + $0x20] sm:$0xff] (!%p454_p2)  }
   0xc   : > { %2314 = vmatprep.subr.bf16.mxu0 (!%p454_p2), %v2584_v4  ;;  %2556 = vmatprep.subr.bf16.mxu1 (!%p454_p2), %v2584_v4  ;;  %v2625_v37 = vld [vmem:[%s3307_s4 + $0x28] sm:$0xff] (!%p454_p2)   ;;  %v2626_v38 = vld [vmem:[%s3307_s4 + $0x30] sm:$0xff] (!%p454_p2)   ;;  %v2627_v39 = vld [vmem:[%s3307_s4 + $0x38] sm:$0xff] (!%p454_p2)  }
   0xd   : > { %s3320_s22 = smov (!%p514_p3, %s2207_s22), 31  ;;  %v2904_v40 = vld [vmem:[%s3309_s6] sm:$0xff]  }
   0xe   : > { %s2829_s24 = sshll.u32 %s3320_s22, 3  ;;  %v2910_v42 = vld [vmem:[%s3306_s3] ss:$0 sm:$0xff]  ;;  %s2309_s28 = sshll.u32 %s3320_s22, 4 }
   0xf   : > { %2315 = vmatpush3.bf16.msra.mxu0 %v2585_v5  ;;  %2564 = vmatpush3.bf16.msra.mxu1 %v2585_v5  ;;  %s2838_s29 = scalar_lea.vmem %s3303_s0, %s2829_s24  ;;  %s2974_s17 = scalar_lea.vmem %s3318_s15, %s2829_s24 }
  0x10   : > { %2316 = vmatprep.subr.bf16.mxu0 %v2586_v6  ;;  %2557 = vmatprep.subr.bf16.mxu1 %v2586_v6  ;;  %v2598_v11 = vld [vmem:[%s2838_s29 + $0x4] ss:$8 sps:$4 sm:$0xff]   ;;  %v2596_v18 = vld [vmem:[%s2838_s29] ss:$8 sps:$4 sm:$0xff]   ;;  %v2599_v19 = vld [vmem:[%s2838_s29 + $0x14] ss:$8 sps:$4 sm:$0xff]   ;;  %s3113_s25 = scalar_lea.vmem %s3304_s1, %s2829_s24 }
  0x11   : > { %803 = vmatprep.mubr.bf16.mxu0 %v2598_v11  ;;  %v2606_v14 = vld [vmem:[%s2838_s29 + $0x44] ss:$8 sps:$4 sm:$0xff]   ;;  %v2604_v20 = vld [vmem:[%s2838_s29 + $0x40] ss:$8 sps:$4 sm:$0xff]   ;;  %v2610_v22 = vld [vmem:[%s2838_s29 + $0x54] ss:$8 sps:$4 sm:$0xff]  }
  0x12   : > { %835 = vmatprep.mubr.bf16.mxu1 %v2606_v14  ;;  %v2601_v25 = vld [vmem:[%s2838_s29 + $0x10] ss:$8 sps:$4 sm:$0xff]   ;;  %v2602_v26 = vld [vmem:[%s2838_s29 + $0x24] ss:$8 sps:$4 sm:$0xff]   ;;  %v2607_v29 = vld [vmem:[%s2838_s29 + $0x20] ss:$8 sps:$4 sm:$0xff]  }
  0x13   : > { %2317 = vmatpush3.bf16.msra.mxu0 %v2587_v7  ;;  %2565 = vmatpush3.bf16.msra.mxu1 %v2587_v7  ;;  %v2613_v27 = vld [vmem:[%s2838_s29 + $0x50] ss:$8 sps:$4 sm:$0xff]   ;;  %v2614_v28 = vld [vmem:[%s2838_s29 + $0x64] ss:$8 sps:$4 sm:$0xff]   ;;  %v2608_v30 = vld [vmem:[%s2838_s29 + $0x34] ss:$8 sps:$4 sm:$0xff]  }
  0x14   : > { %2318 = vmatprep.subr.bf16.mxu0 %v2588_v8  ;;  %2558 = vmatprep.subr.bf16.mxu1 %v2588_v8  ;;  %v2616_v31 = vld [vmem:[%s2838_s29 + $0x60] ss:$8 sps:$4 sm:$0xff]   ;;  %v2617_v32 = vld [vmem:[%s2838_s29 + $0x74] ss:$8 sps:$4 sm:$0xff]   ;;  %v2612_v33 = vld [vmem:[%s2838_s29 + $0x30] ss:$8 sps:$4 sm:$0xff]  }
  0x15   : > { %v2619_v34 = vld [vmem:[%s2838_s29 + $0x70] ss:$8 sps:$4 sm:$0xff]  }
  0x17   : > { %2319 = vmatpush3.bf16.msra.mxu0 %v2589_v9  ;;  %2566 = vmatpush3.bf16.msra.mxu1 %v2589_v9 }
  0x18   : > { %2320 = vmatprep.subr.bf16.mxu0 %v2590_v10  ;;  %2559 = vmatprep.subr.bf16.mxu1 %v2590_v10 }
  0x1b   : > { %2321 = vmatpush3.bf16.msra.mxu0 %v2591_v12  ;;  %2567 = vmatpush3.bf16.msra.mxu1 %v2591_v12 }
  0x1c   : > { %2322 = vmatprep.subr.bf16.mxu0 %v2592_v13  ;;  %2560 = vmatprep.subr.bf16.mxu1 %v2592_v13 }
  0x1f   : > { %2323 = vmatpush3.bf16.msra.mxu0 %v2593_v15  ;;  %2568 = vmatpush3.bf16.msra.mxu1 %v2593_v15 }
  0x20   : > { %2324 = vmatprep.subr.bf16.mxu0 %v2594_v16  ;;  %2561 = vmatprep.subr.bf16.mxu1 %v2594_v16 }
  0x23   : > { %2325 = vmatpush3.bf16.msra.mxu0 %v2595_v17  ;;  %2569 = vmatpush3.bf16.msra.mxu1 %v2595_v17 }
  0x24   : > { %2434 = vmatprep.subr.bf16.mxu1 %v2620_v21 }
  0x26   : > { %804 = vmatmul.mubr.bf16.vlgmr.msra.gmra.mrb[0].mxu0 %v2596_v18  ;;  %836 = vmatmul.mubr.bf16.vlgmr.msra.gmra.mrb[0].mxu1 %v2604_v20 }
  0x27   : > { %811 = vmatprep.mubr.bf16.mxu0 %v2599_v19  ;;  %843 = vmatprep.mubr.bf16.mxu1 %v2610_v22 }
  0x28   : > { %2435 = vmatpush3.bf16.msra.mxu1 %v2620_v21 }
  0x29   : > { %2436 = vmatprep.subr.bf16.mxu1 %v2621_v23 }
  0x2c   : > { %2437 = vmatpush3.bf16.msra.mxu1 %v2621_v23 }
  0x2d   : > { %2438 = vmatprep.subr.bf16.mxu1 %v2622_v24 }
  0x2e   : > { %812 = vmatmul.mubr.bf16.gmra.mrb[4].mxu0 %v2601_v25  ;;  %844 = vmatmul.mubr.bf16.gmra.mrb[4].mxu1 %v2613_v27  ;;  %v2629_v27 = vld [vmem:[%s3309_s6 + $0x8] sm:$0xff]  }
  0x2f   : > { %819 = vmatprep.mubr.bf16.mxu0 %v2602_v26  ;;  %851 = vmatprep.mubr.bf16.mxu1 %v2614_v28 }
  0x30   : > { %2439 = vmatpush3.bf16.msra.mxu1 %v2622_v24 }
  0x31   : > { %2440 = vmatprep.subr.bf16.mxu1 %v2623_v35 }
  0x34   : > { %2441 = vmatpush3.bf16.msra.mxu1 %v2623_v35 }
  0x35   : > { %2442 = vmatprep.subr.bf16.mxu1 %v2624_v36 }
  0x36   : > { %820 = vmatmul.mubr.bf16.gmra.mrb[8].mxu0 %v2607_v29  ;;  %852 = vmatmul.mubr.bf16.gmra.mrb[8].mxu1 %v2616_v31 }
  0x37   : > { %827 = vmatprep.mubr.bf16.mxu0 %v2608_v30  ;;  %859 = vmatprep.mubr.bf16.mxu1 %v2617_v32 }
  0x38   : > { %2443 = vmatpush3.bf16.msra.mxu1 %v2624_v36 }
  0x39   : > { %2444 = vmatprep.subr.bf16.mxu1 %v2625_v37 }
  0x3c   : > { %2445 = vmatpush3.bf16.msra.mxu1 %v2625_v37 }
  0x3d   : > { %2446 = vmatprep.subr.bf16.mxu1 %v2626_v38 }
  0x3e   : > { %828 = vmatmul.mubr.bf16.gmra.mrb[12].mxu0 %v2612_v33  ;;  %860 = vmatmul.mubr.bf16.gmra.mrb[12].mxu1 %v2619_v34 }
  0x40   : > { %2447 = vmatpush3.bf16.msra.mxu1 %v2626_v38  ;;  %v2630_v38 = vld [vmem:[%s3309_s6 + $0x10] sm:$0xff]  }
  0x41   : > { %2448 = vmatprep.subr.bf16.mxu1 %v2627_v39 }
  0x44   : > { %2449 = vmatpush3.bf16.msra.mxu1 %v2627_v39 }
  0x45   : > { %2466 = vmatprep.subr.bf16.mxu1 %v2904_v40 }
  0xf9   : > { %v2326_v41 = vpop.f32.mrb[0].mxu0  ;;  %v2350_v44 = vpop.f32.mrb[0].mxu1 }
  0xfa   : > { %v2327_v43 = vpop.f32.mrb[1].mxu0  ;;  %v2351_v47 = vpop.f32.mrb[1].mxu1 }
  0xfb   : > { %v2328_v45 = vadd.f32 %v2327_v43, %v2326_v41  ;;  %v2329_v46 = vpop.f32.mrb[2].mxu0  ;;  %v2352_v49 = vadd.f32 %v2351_v47, %v2350_v44  ;;  %v2353_v50 = vpop.f32.mrb[2].mxu1 }
  0xfc   : > { %v2330_v48 = vpop.f32.mrb[3].mxu0  ;;  %v2354_v53 = vpop.f32.mrb[3].mxu1 }
  0xfd   : > { %v806_v51 = vadd.f32 %v2328_v45, %v2910_v42  ;;  %v2331_v52 = vadd.f32 %v2330_v48, %v2329_v46  ;;  %v838_v54 = vadd.f32 %v2352_v49, %v2910_v42  ;;  %v2355_v55 = vadd.f32 %v2354_v53, %v2353_v50 }
  0xff   : > { %v809_v56 = vadd.f32 %v2331_v52, %v2910_v42  ;;  %v876_v57 = vmax.f32 %v838_v54, 0.0  ;;  %v841_v58 = vadd.f32 %v2355_v55, %v2910_v42  ;;  %v868_v59 = vmax.f32 %v806_v51, 0.0  ;;  %v2631_v52 = vld [vmem:[%s3309_s6 + $0x18] sm:$0xff]  }
 0x101   : > { %v869_v60 = vmax.f32 %v809_v56, 0.0  ;;  %v2332_v61 = vpop.f32.mrb[4].mxu0  ;;  %v877_v63 = vmax.f32 %v841_v58, 0.0  ;;  %v2356_v0 = vpop.f32.mrb[4].mxu1 }
 0x102   : > { %v2333_v62 = vpop.f32.mrb[5].mxu0  ;;  %v2357_v4 = vpop.f32.mrb[5].mxu1 }
 0x103   : > { %v2334_v1 = vadd.f32 %v2333_v62, %v2332_v61  ;;  %v2335_v2 = vpop.f32.mrb[6].mxu0  ;;  %v884_v3 = vpack.c.bf16 %v869_v60, %v868_v59  ;;  %v2358_v6 = vadd.f32 %v2357_v4, %v2356_v0  ;;  %v2359_v7 = vpop.f32.mrb[6].mxu1  ;;  %v2916_v8 = vpack.c.bf16 %v877_v63, %v876_v57  ;;  %v2632_v63 = vld [vmem:[%s3309_s6 + $0x20] sm:$0xff]  }
 0x104   : > { %v2336_v5 = vpop.f32.mrb[7].mxu0  ;;  %v2360_v11 = vpop.f32.mrb[7].mxu1 }
 0x105   : > { %v814_v9 = vadd.f32 %v2334_v1, %v2910_v42  ;;  %v2337_v10 = vadd.f32 %v2336_v5, %v2335_v2  ;;  %2450 = vmatprep.mubr.bf16.mxu1 %v884_v3  ;;  %v846_v12 = vadd.f32 %v2358_v6, %v2910_v42  ;;  %v2361_v13 = vadd.f32 %v2360_v11, %v2359_v7  ;;  %v2633_v6 = vld [vmem:[%s3309_s6 + $0x28] sm:$0xff]  }
 0x107   : > { %v817_v14 = vadd.f32 %v2337_v10, %v2910_v42  ;;  %v878_v15 = vmax.f32 %v846_v12, 0.0  ;;  %v849_v16 = vadd.f32 %v2361_v13, %v2910_v42  ;;  %v870_v17 = vmax.f32 %v814_v9, 0.0  ;;  %v2635_v9 = vld [vmem:[%s3309_s6 + $0x38] sm:$0xff]  }
 0x109   : > { %v871_v18 = vmax.f32 %v817_v14, 0.0  ;;  %v2338_v19 = vpop.f32.mrb[8].mxu0  ;;  %v879_v21 = vmax.f32 %v849_v16, 0.0  ;;  %v2362_v22 = vpop.f32.mrb[8].mxu1 }
 0x10a   : > { %v2339_v20 = vpop.f32.mrb[9].mxu0  ;;  %v2363_v26 = vpop.f32.mrb[9].mxu1 }
 0x10b   : > { %v885_v23 = vpack.c.bf16 %v871_v18, %v870_v17  ;;  %v2340_v24 = vadd.f32 %v2339_v20, %v2338_v19  ;;  %v2341_v25 = vpop.f32.mrb[10].mxu0  ;;  %v2364_v29 = vadd.f32 %v2363_v26, %v2362_v22  ;;  %v2365_v30 = vpop.f32.mrb[10].mxu1  ;;  %v889_v31 = vpack.c.bf16 %v879_v21, %v878_v15 }
 0x10c   : > { %v2342_v28 = vpop.f32.mrb[11].mxu0  ;;  %v2366_v34 = vpop.f32.mrb[11].mxu1 }
 0x10d   : > { %v822_v32 = vadd.f32 %v2340_v24, %v2910_v42  ;;  %v2343_v33 = vadd.f32 %v2342_v28, %v2341_v25  ;;  %2451 = vmatmul.mubr.bf16.vlgmr.msra.gmra.mrb[16].mxu1 %v885_v23  ;;  %v854_v35 = vadd.f32 %v2364_v29, %v2910_v42  ;;  %v2367_v36 = vadd.f32 %v2366_v34, %v2365_v30 }
 0x10e   : > { %2467 = vmatpush3.bf16.msra.mxu1 %v2904_v40 }
 0x10f   : > { %v825_v37 = vadd.f32 %v2343_v33, %v2910_v42  ;;  %2468 = vmatprep.subr.bf16.mxu1 %v2629_v27  ;;  %v880_v39 = vmax.f32 %v854_v35, 0.0  ;;  %v857_v41 = vadd.f32 %v2367_v36, %v2910_v42  ;;  %v872_v43 = vmax.f32 %v822_v32, 0.0 }
 0x111   : > { %v873_v44 = vmax.f32 %v825_v37, 0.0  ;;  %v2344_v45 = vpop.f32.mrb[12].mxu0  ;;  %v881_v47 = vmax.f32 %v857_v41, 0.0  ;;  %v2368_v48 = vpop.f32.mrb[12].mxu1 }
 0x112   : > { %v2345_v46 = vpop.f32.mrb[13].mxu0  ;;  %2469 = vmatpush3.bf16.msra.mxu1 %v2629_v27  ;;  %v2369_v51 = vpop.f32.mrb[13].mxu1 }
 0x113   : > { %v2346_v49 = vadd.f32 %v2345_v46, %v2344_v45  ;;  %v2347_v50 = vpop.f32.mrb[14].mxu0  ;;  %v886_v40 = vpack.c.bf16 %v873_v44, %v872_v43  ;;  %2470 = vmatprep.subr.bf16.mxu1 %v2630_v38  ;;  %v2370_v54 = vadd.f32 %v2369_v51, %v2368_v48  ;;  %v2371_v55 = vpop.f32.mrb[14].mxu1  ;;  %v890_v56 = vpack.c.bf16 %v881_v47, %v880_v39 }
 0x114   : > { %v2348_v53 = vpop.f32.mrb[15].mxu0  ;;  %v2372_v59 = vpop.f32.mrb[15].mxu1 }
 0x115   : > { %v830_v57 = vadd.f32 %v2346_v49, %v2910_v42  ;;  %v2349_v58 = vadd.f32 %v2348_v53, %v2347_v50  ;;  %2454 = vmatprep.mubr.bf16.mxu1 %v886_v40  ;;  %v862_v60 = vadd.f32 %v2370_v54, %v2910_v42  ;;  %v2373_v61 = vadd.f32 %v2372_v59, %v2371_v55 }
 0x116   : > { %2471 = vmatpush3.bf16.msra.mxu1 %v2630_v38 }
 0x117   : > { %v833_v62 = vadd.f32 %v2349_v58, %v2910_v42  ;;  %2472 = vmatprep.subr.bf16.mxu1 %v2631_v52  ;;  %v882_v0 = vmax.f32 %v862_v60, 0.0  ;;  %v865_v1 = vadd.f32 %v2373_v61, %v2910_v42  ;;  %v874_v2 = vmax.f32 %v830_v57, 0.0  ;;  %v2634_v42 = vld [vmem:[%s3309_s6 + $0x30] sm:$0xff]  }
 0x119   : > { %v875_v3 = vmax.f32 %v833_v62, 0.0  ;;  %v883_v4 = vmax.f32 %v865_v1, 0.0 }
 0x11a   : > { %2473 = vmatpush3.bf16.msra.mxu1 %v2631_v52 }
 0x11b   : > { %v887_v5 = vpack.c.bf16 %v875_v3, %v874_v2  ;;  %2474 = vmatprep.subr.bf16.mxu1 %v2632_v63  ;;  %v891_v7 = vpack.c.bf16 %v883_v4, %v882_v0  ;;  %v2636_v3 = vld [vmem:[%s3311_s8] sm:$0xff]   ;;  %v2637_v4 = vld [vmem:[%s3311_s8 + $0x8] sm:$0xff]  }
 0x11c   : > { %2498 = vmatprep.subr.bf16.mxu0 %v2636_v3 }
 0x11d   : > { %2455 = vmatmul.mubr.bf16.gmra.mrb[20].mxu1 %v887_v5  ;;  %2499 = vmatpush3.bf16.msra.mxu0 %v2636_v3  ;;  %v2638_v5 = vld [vmem:[%s3311_s8 + $0x10] sm:$0xff]  }
 0x11e   : > { %2458 = vmatprep.mubr.bf16.mxu1 %v2916_v8  ;;  %2475 = vmatpush3.bf16.msra.mxu1 %v2632_v63  ;;  %v2250_v8 = vld [vmem:[%s3308_s5] ss:$0 sm:$0xff] }
 0x11f   : > { %2476 = vmatprep.subr.bf16.mxu1 %v2633_v6  ;;  %2500 = vmatprep.subr.bf16.mxu0 %v2637_v4 }
 0x121   : > { %2501 = vmatpush3.bf16.msra.mxu0 %v2637_v4 }
 0x122   : > { %2477 = vmatpush3.bf16.msra.mxu1 %v2633_v6  ;;  %2502 = vmatprep.subr.bf16.mxu0 %v2638_v5  ;;  %v2968_v6 = vld [vmem:[%s3310_s7] ss:$0 sm:$0xff] }
 0x123   : > { %2478 = vmatprep.subr.bf16.mxu1 %v2634_v42 }
 0x125   : > { %2459 = vmatmul.mubr.bf16.gmra.mrb[24].mxu1 %v889_v31  ;;  %2503 = vmatpush3.bf16.msra.mxu0 %v2638_v5 }
 0x126   : > { %2462 = vmatprep.mubr.bf16.mxu1 %v890_v56  ;;  %2479 = vmatpush3.bf16.msra.mxu1 %v2634_v42 }
 0x127   : > { %2480 = vmatprep.subr.bf16.mxu1 %v2635_v9 }
 0x12a   : > { %2481 = vmatpush3.bf16.msra.mxu1 %v2635_v9 }
 0x12d   : > { %2463 = vmatmul.mubr.bf16.gmra.mrb[28].mxu1 %v891_v7 }
 0x1e0   : > { %v2452_v10 = vpop.f32.mrb[16].mxu1 }
 0x1e1   : > { %v1006_v11 = vadd.f32 %v2452_v10, %v2250_v8  ;;  %v997_v12 = vpop.f32.mrb[17].mxu1 }
 0x1e2   : > { %v998_v13 = vadd.f32 %v2250_v8, %v997_v12  ;;  %v2453_v14 = vpop.f32.mrb[18].mxu1 }
 0x1e3   : > { %v1009_v15 = vadd.f32 %v2453_v14, %v2250_v8  ;;  %v1000_v16 = vpop.f32.mrb[19].mxu1  ;;  %v1062_v18 = vmax.f32 %v1006_v11, 0.0 }
 0x1e4   : > { %v1001_v17 = vadd.f32 %v2250_v8, %v1000_v16  ;;  %v1060_v20 = vmax.f32 %v998_v13, 0.0 }
 0x1e5   : > { %v1063_v19 = vmax.f32 %v1009_v15, 0.0 }
 0x1e6   : > { %v1061_v21 = vmax.f32 %v1001_v17, 0.0 }
 0x1e7   : > { %v1077_v22 = vpack.c.bf16 %v1063_v19, %v1062_v18 }
 0x1e8   : > { %v1076_v23 = vpack.c.bf16 %v1061_v21, %v1060_v20 }
 0x1ea   : > { %2482 = vmatprep.mubr.bf16.mxu1 %v1076_v23 }
 0x1eb   : > { %2483 = vmatmul.mubr.bf16.vlgmr.msra.gmra.mrb[32].mxu1 %v1077_v22  ;;  %v2639_v22 = vld [vmem:[%s3311_s8 + $0x18] sm:$0xff]  }
 0x1ec   : > { %2504 = vmatprep.subr.bf16.mxu0 %v2639_v22 }
 0x1ed   : > { %2505 = vmatpush3.bf16.msra.mxu0 %v2639_v22 }
 0x1f0   : > { %v2456_v24 = vpop.f32.mrb[20].mxu1 }
 0x1f1   : > { %v1022_v25 = vadd.f32 %v2456_v24, %v2250_v8  ;;  %v1013_v26 = vpop.f32.mrb[21].mxu1 }
 0x1f2   : > { %v1014_v27 = vadd.f32 %v2250_v8, %v1013_v26  ;;  %v2457_v28 = vpop.f32.mrb[22].mxu1 }
 0x1f3   : > { %v1025_v29 = vadd.f32 %v2457_v28, %v2250_v8  ;;  %v1016_v30 = vpop.f32.mrb[23].mxu1  ;;  %v1066_v32 = vmax.f32 %v1022_v25, 0.0 }
 0x1f4   : > { %v1017_v31 = vadd.f32 %v2250_v8, %v1016_v30  ;;  %v1064_v34 = vmax.f32 %v1014_v27, 0.0 }
 0x1f5   : > { %v1067_v33 = vmax.f32 %v1025_v29, 0.0 }
 0x1f6   : > { %v1065_v35 = vmax.f32 %v1017_v31, 0.0 }
 0x1f7   : > { %v1079_v36 = vpack.c.bf16 %v1067_v33, %v1066_v32 }
 0x1f8   : > { %v1078_v37 = vpack.c.bf16 %v1065_v35, %v1064_v34  ;;  %v2460_v38 = vpop.f32.mrb[24].mxu1 }
 0x1f9   : > { %v1038_v39 = vadd.f32 %v2460_v38, %v2250_v8  ;;  %v1029_v41 = vpop.f32.mrb[25].mxu1 }
 0x1fa   : > { %v1030_v43 = vadd.f32 %v2250_v8, %v1029_v41  ;;  %v2461_v44 = vpop.f32.mrb[26].mxu1  ;;  %2486 = vmatprep.mubr.bf16.mxu1 %v1078_v37 }
 0x1fb   : > { %v1070_v45 = vmax.f32 %v1038_v39, 0.0  ;;  %v1041_v46 = vadd.f32 %v2461_v44, %v2250_v8  ;;  %v1032_v47 = vpop.f32.mrb[27].mxu1  ;;  %2487 = vmatmul.mubr.bf16.gmra.mrb[36].mxu1 %v1079_v36 }
 0x1fc   : > { %v1068_v48 = vmax.f32 %v1030_v43, 0.0  ;;  %v1033_v49 = vadd.f32 %v2250_v8, %v1032_v47 }
 0x1fd   : > { %v1071_v50 = vmax.f32 %v1041_v46, 0.0 }
 0x1fe   : > { %v1069_v40 = vmax.f32 %v1033_v49, 0.0 }
 0x1ff   : > { %v1081_v51 = vpack.c.bf16 %v1071_v50, %v1070_v45 }
 0x200   : > { %v1080_v52 = vpack.c.bf16 %v1069_v40, %v1068_v48  ;;  %v2464_v53 = vpop.f32.mrb[28].mxu1 }
 0x201   : > { %v1054_v54 = vadd.f32 %v2464_v53, %v2250_v8  ;;  %v1045_v55 = vpop.f32.mrb[29].mxu1 }
 0x202   : > { %v1046_v56 = vadd.f32 %v2250_v8, %v1045_v55  ;;  %v2465_v57 = vpop.f32.mrb[30].mxu1  ;;  %2490 = vmatprep.mubr.bf16.mxu1 %v1080_v52 }
 0x203   : > { %v1074_v58 = vmax.f32 %v1054_v54, 0.0  ;;  %v1057_v59 = vadd.f32 %v2465_v57, %v2250_v8  ;;  %v1048_v60 = vpop.f32.mrb[31].mxu1  ;;  %2491 = vmatmul.mubr.bf16.gmra.mrb[40].mxu1 %v1081_v51 }
 0x204   : > { %v1072_v61 = vmax.f32 %v1046_v56, 0.0  ;;  %v1049_v62 = vadd.f32 %v2250_v8, %v1048_v60 }
 0x205   : > { %v1075_v63 = vmax.f32 %v1057_v59, 0.0 }
 0x206   : > { %v1073_v0 = vmax.f32 %v1049_v62, 0.0 }
 0x207   : > { %v1083_v1 = vpack.c.bf16 %v1075_v63, %v1074_v58 }
 0x208   : > { %v1082_v2 = vpack.c.bf16 %v1073_v0, %v1072_v61 }
 0x20a   : > { %2494 = vmatprep.mubr.bf16.mxu1 %v1082_v2 }
 0x20b   : > { %2495 = vmatmul.mubr.bf16.gmra.mrb[44].mxu1 %v1083_v1 }
 0x2be   : > { %v2484_v7 = vpop.f32.mrb[32].mxu1 }
 0x2bf   : > { %v2977_v42 = vadd.f32 %v2484_v7, %v2968_v6  ;;  %v1189_v9 = vpop.f32.mrb[33].mxu1 }
 0x2c0   : > { %v2980_v8 = vadd.f32 %v2968_v6, %v1189_v9  ;;  %v2485_v10 = vpop.f32.mrb[34].mxu1 }
 0x2c1   : > { %v1270_v11 = vmul.f32 0.5, %v2977_v42  ;;  %2084 = vst [vmem:[%s2974_s17 + $0x10] sm:$0xff] %v2977_v42  ;;  %v2986_v12 = vadd.f32 %v2485_v10, %v2968_v6  ;;  %v1192_v13 = vpop.f32.mrb[35].mxu1 }
 0x2c2   : > { %v1268_v14 = vmul.f32 0.5, %v2980_v8  ;;  %2082 = vst [vmem:[%s2974_s17] sm:$0xff] %v2980_v8  ;;  %v2992_v15 = vadd.f32 %v2968_v6, %v1192_v13 }
 0x2c3   : > { %v1288_v16 = vmul.f32 1.442695, %v1270_v11  ;;  %v1271_v17 = vmul.f32 0.5, %v2986_v12  ;;  %2085 = vst [vmem:[%s2974_s17 + $0x18] sm:$0xff] %v2986_v12 }
 0x2c4   : > { %v1284_v18 = vmul.f32 1.442695, %v1268_v14  ;;  %v1269_v19 = vmul.f32 0.5, %v2992_v15  ;;  %2083 = vst [vmem:[%s2974_s17 + $0x8] sm:$0xff] %v2992_v15 }
 0x2c5   : > { %2672 = vpow2.f32 %v1288_v16  ;;  %v1290_v20 = vmul.f32 1.442695, %v1271_v17 }
 0x2c6   : > { %2674 = vpow2.f32 %v1284_v18  ;;  %v1286_v21 = vmul.f32 1.442695, %v1269_v19 }
 0x2c7   : > { %2676 = vpow2.f32 %v1290_v20 }
 0x2c8   : > { %2678 = vpow2.f32 %v1286_v21 }
 0x2ce   : > { %v2488_v23 = vpop.f32.mrb[36].mxu1 }
 0x2cf   : > { %v2673_v24 = vpop.eup %2672  ;;  %v3004_v25 = vadd.f32 %v2488_v23, %v2968_v6  ;;  %v1205_v26 = vpop.f32.mrb[37].mxu1 }
 0x2d0   : > { %v2675_v27 = vpop.eup %2674  ;;  %v3007_v28 = vadd.f32 %v2968_v6, %v1205_v26  ;;  %1336 = vrot.lane.b32.xlu1 %v2673_v24, %s2712_s20  ;;  %v2489_v29 = vpop.f32.mrb[38].mxu1  ;;  %v2640_v24 = vld [vmem:[%s3313_s10] sm:$0xff]   ;;  %v2641_v26 = vld [vmem:[%s3313_s10 + $0x8] sm:$0xff]  }
 0x2d1   : > { %2088 = vst [vmem:[%s2974_s17 + $0x30] sm:$0xff] %v3004_v25  ;;  %v3013_v30 = vadd.f32 %v2489_v29, %v2968_v6  ;;  %v1208_v31 = vpop.f32.mrb[39].mxu1  ;;  %1332 = vrot.lane.b32.xlu0 %v2675_v27, %s2712_s20  ;;  %v1274_v32 = vmul.f32 0.5, %v3004_v25  ;;  %v2677_v35 = vpop.eup %2676  ;;  %2522 = vmatprep.subr.bf16.mxu1 %v2640_v24 }
 0x2d2   : > { %v1272_v33 = vmul.f32 0.5, %v3007_v28  ;;  %2086 = vst [vmem:[%s2974_s17 + $0x20] sm:$0xff] %v3007_v28  ;;  %v3021_v34 = vadd.f32 %v2968_v6, %v1208_v31  ;;  %v2679_v36 = vpop.eup %2678  ;;  %2523 = vmatpush3.bf16.msra.mxu1 %v2640_v24 }
 0x2d3   : > { %2089 = vst [vmem:[%s2974_s17 + $0x38] sm:$0xff] %v3013_v30  ;;  %v1275_v38 = vmul.f32 0.5, %v3013_v30  ;;  %v1296_v41 = vmul.f32 1.442695, %v1274_v32  ;;  %2524 = vmatprep.subr.bf16.mxu1 %v2641_v26  ;;  %v2642_v32 = vld [vmem:[%s3313_s10 + $0x10] sm:$0xff]  }
 0x2d4   : > { %v1292_v37 = vmul.f32 1.442695, %v1272_v33  ;;  %v1273_v39 = vmul.f32 0.5, %v3021_v34  ;;  %2087 = vst [vmem:[%s2974_s17 + $0x28] sm:$0xff] %v3021_v34  ;;  %1338 = vrot.lane.b32.xlu1 %v2677_v35, %s2712_s20  ;;  %v2643_v33 = vld [vmem:[%s3313_s10 + $0x18] sm:$0xff]   ;;  %v2644_v35 = vld [vmem:[%s3313_s10 + $0x20] sm:$0xff]  }
 0x2d5   : > { %1334 = vrot.lane.b32.xlu0 %v2679_v36, %s2712_s20  ;;  %v1298_v47 = vmul.f32 1.442695, %v1275_v38  ;;  %v2645_v36 = vld [vmem:[%s3313_s10 + $0x28] sm:$0xff]   ;;  %v1252_v38 = vld [vmem:[%s3113_s25] sm:$0xff] }
 0x2d6   : > { %2680 = vpow2.f32 %v1292_v37  ;;  %v1294_v43 = vmul.f32 1.442695, %v1273_v39  ;;  %v2492_v44 = vpop.f32.mrb[40].mxu1  ;;  %2525 = vmatpush3.bf16.msra.mxu1 %v2641_v26 }
 0x2d7   : > { %v3032_v45 = vadd.f32 %v2492_v44, %v2968_v6  ;;  %v1221_v46 = vpop.f32.mrb[41].mxu1  ;;  %2526 = vmatprep.subr.bf16.mxu1 %v2642_v32  ;;  %v1253_v44 = vld [vmem:[%s3113_s25 + $0x8] sm:$0xff] }
 0x2d8   : > { %2682 = vpow2.f32 %v1294_v43  ;;  %v3035_v48 = vadd.f32 %v2968_v6, %v1221_v46  ;;  %v2493_v49 = vpop.f32.mrb[42].mxu1  ;;  %v1255_v43 = vld [vmem:[%s3113_s25 + $0x18] sm:$0xff] }
 0x2d9   : > { %2092 = vst [vmem:[%s2974_s17 + $0x50] sm:$0xff] %v3032_v45  ;;  %v3040_v50 = vadd.f32 %v2493_v49, %v2968_v6  ;;  %v1224_v40 = vpop.f32.mrb[43].mxu1  ;;  %2684 = vpow2.f32 %v1296_v41  ;;  %v1278_v51 = vmul.f32 0.5, %v3032_v45  ;;  %v1254_v41 = vld [vmem:[%s3113_s25 + $0x10] sm:$0xff] }
 0x2da   : > { %v1276_v52 = vmul.f32 0.5, %v3035_v48  ;;  %2090 = vst [vmem:[%s2974_s17 + $0x40] sm:$0xff] %v3035_v48  ;;  %v3047_v53 = vadd.f32 %v2968_v6, %v1224_v40  ;;  %2686 = vpow2.f32 %v1298_v47  ;;  %2527 = vmatpush3.bf16.msra.mxu1 %v2642_v32 }
 0x2db   : > { %2093 = vst [vmem:[%s2974_s17 + $0x58] sm:$0xff] %v3040_v50  ;;  %v1279_v55 = vmul.f32 0.5, %v3040_v50  ;;  %v1304_v57 = vmul.f32 1.442695, %v1278_v51  ;;  %2528 = vmatprep.subr.bf16.mxu1 %v2643_v33 }
 0x2dc   : > { %v1300_v54 = vmul.f32 1.442695, %v1276_v52  ;;  %v1277_v56 = vmul.f32 0.5, %v3047_v53  ;;  %2091 = vst [vmem:[%s2974_s17 + $0x48] sm:$0xff] %v3047_v53 }
 0x2dd   : > { %v1306_v63 = vmul.f32 1.442695, %v1279_v55 }
 0x2de   : > { %2688 = vpow2.f32 %v1300_v54  ;;  %v1302_v58 = vmul.f32 1.442695, %v1277_v56  ;;  %v2496_v59 = vpop.f32.mrb[44].mxu1  ;;  %2529 = vmatpush3.bf16.msra.mxu1 %v2643_v33  ;;  %v1265_v33 = vld [vmem:[%s3113_s25 + $0x68] sm:$0xff] }
 0x2df   : > { %v3056_v60 = vadd.f32 %v2496_v59, %v2968_v6  ;;  %v1237_v61 = vpop.f32.mrb[45].mxu1  ;;  %2530 = vmatprep.subr.bf16.mxu1 %v2644_v35 }
 0x2e0   : > { %v2681_v62 = vpop.eup %2680  ;;  %2690 = vpow2.f32 %v1302_v58  ;;  %v3059_v0 = vadd.f32 %v2968_v6, %v1237_v61  ;;  %v2497_v1 = vpop.f32.mrb[46].mxu1  ;;  %v1256_v61 = vld [vmem:[%s3113_s25 + $0x20] sm:$0xff] }
 0x2e1   : > { %v1282_v2 = vmul.f32 0.5, %v3056_v60  ;;  %2096 = vst [vmem:[%s2974_s17 + $0x70] sm:$0xff] %v3056_v60  ;;  %v3065_v3 = vadd.f32 %v2497_v1, %v2968_v6  ;;  %v1240_v4 = vpop.f32.mrb[47].mxu1  ;;  %1340 = vrot.lane.b32.xlu0 %v2681_v62, %s2712_s20  ;;  %2692 = vpow2.f32 %v1304_v57 }
 0x2e2   : > { %v2683_v5 = vpop.eup %2682  ;;  %v1280_v7 = vmul.f32 0.5, %v3059_v0  ;;  %2094 = vst [vmem:[%s2974_s17 + $0x60] sm:$0xff] %v3059_v0  ;;  %v3072_v9 = vadd.f32 %v2968_v6, %v1240_v4  ;;  %2694 = vpow2.f32 %v1306_v63  ;;  %2531 = vmatpush3.bf16.msra.mxu1 %v2644_v35  ;;  %v1257_v63 = vld [vmem:[%s3113_s25 + $0x28] sm:$0xff] }
 0x2e3   : > { %v1312_v10 = vmul.f32 1.442695, %v1282_v2  ;;  %v1283_v11 = vmul.f32 0.5, %v3065_v3  ;;  %2097 = vst [vmem:[%s2974_s17 + $0x78] sm:$0xff] %v3065_v3  ;;  %1342 = vrot.lane.b32.xlu1 %v2683_v5, %s2712_s20  ;;  %v2685_v13 = vpop.eup %2684  ;;  %2532 = vmatprep.subr.bf16.mxu1 %v2645_v36 }
 0x2e4   : > { %v1308_v14 = vmul.f32 1.442695, %v1280_v7  ;;  %v1281_v16 = vmul.f32 0.5, %v3072_v9  ;;  %2095 = vst [vmem:[%s2974_s17 + $0x68] sm:$0xff] %v3072_v9  ;;  %v2687_v17 = vpop.eup %2686  ;;  %s3235_s17 = scalar_lea.vmem %s3317_s14, %s2309_s28 }
 0x2e5   : > { %1344 = vrot.lane.b32.xlu0 %v2685_v13, %s2712_s20  ;;  %v1314_v6 = vmul.f32 1.442695, %v1283_v11  ;;  %v1260_v11 = vld [vmem:[%s3113_s25 + $0x40] sm:$0xff] }
 0x2e6   : > { %2696 = vpow2.f32 %v1308_v14  ;;  %v1310_v18 = vmul.f32 1.442695, %v1281_v16  ;;  %2533 = vmatpush3.bf16.msra.mxu1 %v2645_v36 }
 0x2e7   : > { %2698 = vpow2.f32 %v1312_v10  ;;  %1346 = vrot.lane.b32.xlu1 %v2687_v17, %s2712_s20  ;;  %v1261_v17 = vld [vmem:[%s3113_s25 + $0x48] sm:$0xff] }
 0x2e8   : > { %v2689_v19 = vpop.eup %2688  ;;  %2700 = vpow2.f32 %v1310_v18 }
 0x2e9   : > { %1348 = vrot.lane.b32.xlu0 %v2689_v19, %s2712_s20  ;;  %2702 = vpow2.f32 %v1314_v6 }
 0x2ea   : > { %v2691_v20 = vpop.eup %2690 }
 0x2eb   : > { %1350 = vrot.lane.b32.xlu1 %v2691_v20, %s2712_s20  ;;  %v2693_v21 = vpop.eup %2692  ;;  %v1262_v20 = vld [vmem:[%s3113_s25 + $0x50] sm:$0xff] }
 0x2ec   : > { %v2695_v22 = vpop.eup %2694 }
 0x2ed   : > { %1352 = vrot.lane.b32.xlu0 %v2693_v21, %s2712_s20 }
 0x2ef   : > { %1354 = vrot.lane.b32.xlu1 %v2695_v22, %s2712_s20 }
 0x2f0   : > { %v2697_v23 = vpop.eup %2696 }
 0x2f1   : > { %v2699_v27 = vpop.eup %2698  ;;  %1356 = vrot.lane.b32.xlu0 %v2697_v23, %s2712_s20  ;;  %v1263_v23 = vld [vmem:[%s3113_s25 + $0x58] sm:$0xff] }
 0x2f2   : > { %v2701_v29 = vpop.eup %2700 }
 0x2f3   : > { %1358 = vrot.lane.b32.xlu1 %v2701_v29, %s2712_s20  ;;  %v2703_v31 = vpop.eup %2702 }
 0x2f5   : > { %1360 = vrot.lane.b32.xlu0 %v2699_v27, %s2712_s20 }
 0x2f7   : > { %1362 = vrot.lane.b32.xlu1 %v2703_v31, %s2712_s20 }
 0x342   : > { %v1337_v37 = vpop.permute.xlu1 %1336 }
 0x343   : > { %v1333_v39 = vpop.permute.xlu0 %1332  ;;  %v1382_v49 = vmul.f32 %v1337_v37, %v1254_v41 }
 0x344   : > { %v1380_v46 = vmul.f32 %v1333_v39, %v1252_v38  ;;  %v1266_v38 = vld [vmem:[%s3113_s25 + $0x70] sm:$0xff] }
 0x345   : > { %v1398_v57 = vadd.f32 %v1382_v49, %v2977_v42 }
 0x346   : > { %v1339_v47 = vpop.permute.xlu1 %1338  ;;  %v1396_v55 = vadd.f32 %v1380_v46, %v2980_v8  ;;  %v1258_v8 = vld [vmem:[%s3113_s25 + $0x30] sm:$0xff] }
 0x347   : > { %v1383_v40 = vmul.f32 %v1339_v47, %v1255_v43  ;;  %v1335_v51 = vpop.permute.xlu0 %1334  ;;  %v1267_v43 = vld [vmem:[%s3113_s25 + $0x78] sm:$0xff] }
 0x348   : > { %v1381_v52 = vmul.f32 %v1335_v51, %v1253_v44 }
 0x349   : > { %v1399_v54 = vadd.f32 %v1383_v40, %v2986_v12 }
 0x34a   : > { %v1397_v56 = vadd.f32 %v1381_v52, %v2992_v15  ;;  %v1259_v15 = vld [vmem:[%s3113_s25 + $0x38] sm:$0xff] }
 0x34b   : > { %v1413_v59 = vpack.c.bf16 %v1399_v54, %v1398_v57  ;;  %v2653_v54 = vld [vmem:[%s3315_s12 + $0x14] ss:$8 sps:$4 sm:$0xff]   ;;  %v2654_v57 = vld [vmem:[%s3315_s12 + $0x20] ss:$8 sps:$4 sm:$0xff]  }
 0x34c   : > { %v1412_v58 = vpack.c.bf16 %v1397_v56, %v1396_v55  ;;  %v2651_v55 = vld [vmem:[%s3315_s12 + $0x10] ss:$8 sps:$4 sm:$0xff]   ;;  %v2656_v56 = vld [vmem:[%s3315_s12 + $0x24] ss:$8 sps:$4 sm:$0xff]  }
 0x34e   : > { %2506 = vmatprep.mubr.msk.bf16.mxu0 %vm1459_vm0, %v1412_v58  ;;  %v2659_v58 = vld [vmem:[%s3315_s12 + $0x34] ss:$8 sps:$4 sm:$0xff]  }
 0x34f   : > { %2507 = vmatmul.mubr.msk.bf16.vlgmr.msra.gmra.mrb[16].mxu0 %vm1459_vm0, %v1413_v59  ;;  %v2657_v59 = vld [vmem:[%s3315_s12 + $0x30] ss:$8 sps:$4 sm:$0xff]  }
 0x353   : > { %v1341_v62 = vpop.permute.xlu0 %1340 }
 0x354   : > { %v1384_v12 = vmul.f32 %v1341_v62, %v1256_v61  ;;  %v2662_v61 = vld [vmem:[%s3315_s12 + $0x44] ss:$8 sps:$4 sm:$0xff]   ;;  %v2660_v62 = vld [vmem:[%s3315_s12 + $0x40] ss:$8 sps:$4 sm:$0xff]  }
 0x355   : > { %v1343_v1 = vpop.permute.xlu1 %1342 }
 0x356   : > { %v1385_v2 = vmul.f32 %v1343_v1, %v1257_v63  ;;  %v1400_v42 = vadd.f32 %v1384_v12, %v3007_v28  ;;  %v2665_v63 = vld [vmem:[%s3315_s12 + $0x54] ss:$8 sps:$4 sm:$0xff]   ;;  %v2663_v12 = vld [vmem:[%s3315_s12 + $0x50] ss:$8 sps:$4 sm:$0xff]   ;;  %v2268_v1 = vld [vmem:[%s3312_s9] ss:$0 sm:$0xff] }
 0x357   : > { %v1345_v4 = vpop.permute.xlu0 %1344 }
 0x358   : > { %v1401_v5 = vadd.f32 %v1385_v2, %v3021_v34  ;;  %v1386_v7 = vmul.f32 %v1345_v4, %v1258_v8 }
 0x359   : > { %v1347_v10 = vpop.permute.xlu1 %1346 }
 0x35a   : > { %v1414_v13 = vpack.c.bf16 %v1401_v5, %v1400_v42  ;;  %v1387_v14 = vmul.f32 %v1347_v10, %v1259_v15  ;;  %v1402_v6 = vadd.f32 %v1386_v7, %v3004_v25 }
 0x35b   : > { %v1349_v16 = vpop.permute.xlu0 %1348 }
 0x35c   : > { %v1403_v18 = vadd.f32 %v1387_v14, %v3013_v30  ;;  %v1388_v19 = vmul.f32 %v1349_v16, %v1260_v11  ;;  %2510 = vmatprep.mubr.msk.bf16.mxu0 %vm1459_vm0, %v1414_v13  ;;  %v1264_v30 = vld [vmem:[%s3113_s25 + $0x60] sm:$0xff] }
 0x35d   : > { %v1351_v28 = vpop.permute.xlu1 %1350 }
 0x35e   : > { %v1415_v34 = vpack.c.bf16 %v1403_v18, %v1402_v6  ;;  %v1389_v21 = vmul.f32 %v1351_v28, %v1261_v17  ;;  %v1404_v24 = vadd.f32 %v1388_v19, %v3035_v48 }
 0x35f   : > { %v1353_v22 = vpop.permute.xlu0 %1352 }
 0x360   : > { %v1405_v26 = vadd.f32 %v1389_v21, %v3047_v53  ;;  %v1390_v27 = vmul.f32 %v1353_v22, %v1262_v20  ;;  %2511 = vmatmul.mubr.msk.bf16.gmra.mrb[20].mxu0 %vm1459_vm0, %v1415_v34 }
 0x361   : > { %v1355_v25 = vpop.permute.xlu1 %1354 }
 0x362   : > { %v1416_v29 = vpack.c.bf16 %v1405_v26, %v1404_v24  ;;  %v1391_v31 = vmul.f32 %v1355_v25, %v1263_v23  ;;  %v1406_v35 = vadd.f32 %v1390_v27, %v3032_v45 }
 0x363   : > { %v1357_v32 = vpop.permute.xlu0 %1356 }
 0x364   : > { %v1407_v36 = vadd.f32 %v1391_v31, %v3040_v50  ;;  %v1392_v37 = vmul.f32 %v1357_v32, %v1264_v30  ;;  %2514 = vmatprep.mubr.msk.bf16.mxu0 %vm1459_vm0, %v1416_v29 }
 0x365   : > { %v1359_v48 = vpop.permute.xlu1 %1358 }
 0x366   : > { %v1417_v53 = vpack.c.bf16 %v1407_v36, %v1406_v35  ;;  %v1393_v39 = vmul.f32 %v1359_v48, %v1265_v33  ;;  %v1408_v44 = vadd.f32 %v1392_v37, %v3059_v0  ;;  %v2646_v0 = vld [vmem:[%s3313_s10 + $0x30] sm:$0xff]  }
 0x367   : > { %v1361_v41 = vpop.permute.xlu0 %1360  ;;  %2534 = vmatprep.subr.bf16.mxu1 %v2646_v0 }
 0x368   : > { %v1409_v46 = vadd.f32 %v1393_v39, %v3072_v9  ;;  %v1394_v47 = vmul.f32 %v1361_v41, %v1266_v38  ;;  %2515 = vmatmul.mubr.msk.bf16.gmra.mrb[24].mxu0 %vm1459_vm0, %v1417_v53  ;;  %2535 = vmatpush3.bf16.msra.mxu1 %v2646_v0  ;;  %v2647_v9 = vld [vmem:[%s3313_s10 + $0x38] sm:$0xff]  }
 0x369   : > { %v1363_v49 = vpop.permute.xlu1 %1362  ;;  %2536 = vmatprep.subr.bf16.mxu1 %v2647_v9 }
 0x36a   : > { %v1418_v45 = vpack.c.bf16 %v1409_v46, %v1408_v44  ;;  %v1395_v40 = vmul.f32 %v1363_v49, %v1267_v43  ;;  %v1410_v50 = vadd.f32 %v1394_v47, %v3056_v60  ;;  %v2648_v60 = vld [vmem:[%s3315_s12] ss:$8 sps:$4 sm:$0xff]  }
 0x36c   : > { %v1411_v51 = vadd.f32 %v1395_v40, %v3065_v3  ;;  %2518 = vmatprep.mubr.msk.bf16.mxu0 %vm1459_vm0, %v1418_v45  ;;  %2537 = vmatpush3.bf16.msra.mxu1 %v2647_v9  ;;  %v2650_v3 = vld [vmem:[%s3315_s12 + $0x4] ss:$8 sps:$4 sm:$0xff]  }
 0x36d   : > { %1905 = vmatprep.subr.bf16.mxu0 %v2650_v3 }
 0x36e   : > { %v1419_v52 = vpack.c.bf16 %v1411_v51, %v1410_v50  ;;  %1906 = vmatpush1.bf16.msra.mxu0 %v2648_v60 }
 0x36f   : > { %1907 = vmatprep.subr.bf16.mxu0 %v2653_v54 }
 0x370   : > { %2519 = vmatmul.mubr.msk.bf16.gmra.mrb[28].mxu0 %vm1459_vm0, %v1419_v52 }
 0x372   : > { %1908 = vmatpush1.bf16.msra.mxu0 %v2651_v55 }
 0x373   : > { %1909 = vmatprep.subr.bf16.mxu0 %v2656_v56 }
 0x376   : > { %1910 = vmatpush1.bf16.msra.mxu0 %v2654_v57  ;;  %v2668_v57 = vld [vmem:[%s3315_s12 + $0x64] ss:$8 sps:$4 sm:$0xff]  }
 0x377   : > { %1911 = vmatprep.subr.bf16.mxu0 %v2659_v58  ;;  %v2666_v58 = vld [vmem:[%s3315_s12 + $0x60] ss:$8 sps:$4 sm:$0xff]  }
 0x37a   : > { %1912 = vmatpush1.bf16.msra.mxu0 %v2657_v59  ;;  %v2671_v59 = vld [vmem:[%s3315_s12 + $0x74] ss:$8 sps:$4 sm:$0xff]  }
 0x37b   : > { %1913 = vmatprep.subr.bf16.mxu0 %v2662_v61  ;;  %v2669_v61 = vld [vmem:[%s3315_s12 + $0x70] ss:$8 sps:$4 sm:$0xff]  }
 0x37e   : > { %1914 = vmatpush1.bf16.msra.mxu0 %v2660_v62  ;;  %v2713_v62 = vmov 0  }
 0x37f   : > { %1915 = vmatprep.subr.bf16.mxu0 %v2665_v63  ;;  %1937 = vmatprep.mubr.bf16.mxu0 %v2713_v62  ;;  %v2281_v63 = vld [vmem:[%s3314_s11] ss:$0 sm:$0xff] }
 0x382   : > { %1916 = vmatpush1.bf16.msra.mxu0 %v2663_v12 }
 0x383   : > { %1917 = vmatprep.subr.bf16.mxu0 %v2668_v57 }
 0x386   : > { %1918 = vmatpush1.bf16.msra.mxu0 %v2666_v58  ;;  %v1813_v58 = vld [vmem:[%s3316_s13] sm:$0x3] }
 0x387   : > { %1919 = vmatprep.subr.bf16.mxu0 %v2671_v59 }
 0x38a   : > { %1920 = vmatpush1.bf16.msra.mxu0 %v2669_v61 }
 0x422   : > { %v2508_v8 = vpop.f32.mrb[16].mxu0 }
 0x423   : > { %v1527_v2 = vadd.f32 %v2508_v8, %v2268_v1  ;;  %v1518_v4 = vpop.f32.mrb[17].mxu0 }
 0x424   : > { %v1519_v15 = vadd.f32 %v2268_v1, %v1518_v4  ;;  %v2509_v42 = vpop.f32.mrb[18].mxu0 }
 0x425   : > { %v1530_v5 = vadd.f32 %v2509_v42, %v2268_v1  ;;  %v1521_v7 = vpop.f32.mrb[19].mxu0  ;;  %v1583_v11 = vmax.f32 %v1527_v2, 0.0 }
 0x426   : > { %v1522_v10 = vadd.f32 %v2268_v1, %v1521_v7  ;;  %v1581_v14 = vmax.f32 %v1519_v15, 0.0 }
 0x427   : > { %v1584_v13 = vmax.f32 %v1530_v5, 0.0 }
 0x428   : > { %v1582_v16 = vmax.f32 %v1522_v10, 0.0 }
 0x429   : > { %v1598_v17 = vpack.c.bf16 %v1584_v13, %v1583_v11 }
 0x42a   : > { %v1597_v6 = vpack.c.bf16 %v1582_v16, %v1581_v14 }
 0x42c   : > { %2538 = vmatprep.mubr.bf16.mxu1 %v1597_v6 }
 0x42d   : > { %2539 = vmatmul.mubr.bf16.vlgmr.msra.gmra.mrb[48].mxu1 %v1598_v17 }
 0x433   : > { %v2512_v18 = vpop.f32.mrb[20].mxu0 }
 0x434   : > { %v1543_v19 = vadd.f32 %v2512_v18, %v2268_v1  ;;  %v1534_v28 = vpop.f32.mrb[21].mxu0 }
 0x435   : > { %v1535_v20 = vadd.f32 %v2268_v1, %v1534_v28  ;;  %v2513_v34 = vpop.f32.mrb[22].mxu0 }
 0x436   : > { %v1546_v21 = vadd.f32 %v2513_v34, %v2268_v1  ;;  %v1537_v22 = vpop.f32.mrb[23].mxu0  ;;  %v1587_v24 = vmax.f32 %v1543_v19, 0.0 }
 0x437   : > { %v1538_v23 = vadd.f32 %v2268_v1, %v1537_v22  ;;  %v1585_v27 = vmax.f32 %v1535_v20, 0.0 }
 0x438   : > { %v1588_v26 = vmax.f32 %v1546_v21, 0.0 }
 0x439   : > { %v1586_v25 = vmax.f32 %v1538_v23, 0.0 }
 0x43a   : > { %v1600_v30 = vpack.c.bf16 %v1588_v26, %v1587_v24 }
 0x43b   : > { %v1599_v29 = vpack.c.bf16 %v1586_v25, %v1585_v27  ;;  %v2516_v31 = vpop.f32.mrb[24].mxu0 }
 0x43c   : > { %v1559_v32 = vadd.f32 %v2516_v31, %v2268_v1  ;;  %v1550_v33 = vpop.f32.mrb[25].mxu0 }
 0x43d   : > { %v1551_v35 = vadd.f32 %v2268_v1, %v1550_v33  ;;  %v2517_v36 = vpop.f32.mrb[26].mxu0  ;;  %2542 = vmatprep.mubr.bf16.mxu1 %v1599_v29 }
 0x43e   : > { %v1562_v37 = vadd.f32 %v2517_v36, %v2268_v1  ;;  %v1553_v48 = vpop.f32.mrb[27].mxu0  ;;  %2543 = vmatmul.mubr.bf16.gmra.mrb[52].mxu1 %v1600_v30  ;;  %v1591_v53 = vmax.f32 %v1559_v32, 0.0 }
 0x43f   : > { %v1554_v38 = vadd.f32 %v2268_v1, %v1553_v48  ;;  %v1589_v41 = vmax.f32 %v1551_v35, 0.0 }
 0x440   : > { %v1592_v39 = vmax.f32 %v1562_v37, 0.0 }
 0x441   : > { %v1590_v43 = vmax.f32 %v1554_v38, 0.0 }
 0x442   : > { %v1602_v44 = vpack.c.bf16 %v1592_v39, %v1591_v53 }
 0x443   : > { %v1601_v46 = vpack.c.bf16 %v1590_v43, %v1589_v41  ;;  %v2520_v47 = vpop.f32.mrb[28].mxu0 }
 0x444   : > { %v1575_v49 = vadd.f32 %v2520_v47, %v2268_v1  ;;  %v1566_v45 = vpop.f32.mrb[29].mxu0 }
 0x445   : > { %v1567_v40 = vadd.f32 %v2268_v1, %v1566_v45  ;;  %v2521_v50 = vpop.f32.mrb[30].mxu0  ;;  %2546 = vmatprep.mubr.bf16.mxu1 %v1601_v46 }
 0x446   : > { %v1578_v51 = vadd.f32 %v2521_v50, %v2268_v1  ;;  %v1569_v52 = vpop.f32.mrb[31].mxu0  ;;  %2547 = vmatmul.mubr.bf16.gmra.mrb[56].mxu1 %v1602_v44  ;;  %v1595_v9 = vmax.f32 %v1575_v49, 0.0 }
 0x447   : > { %v1570_v0 = vadd.f32 %v2268_v1, %v1569_v52  ;;  %v1593_v3 = vmax.f32 %v1567_v40, 0.0 }
 0x448   : > { %v1596_v60 = vmax.f32 %v1578_v51, 0.0 }
 0x449   : > { %v1594_v54 = vmax.f32 %v1570_v0, 0.0 }
 0x44a   : > { %v1604_v55 = vpack.c.bf16 %v1596_v60, %v1595_v9 }
 0x44b   : > { %v1603_v56 = vpack.c.bf16 %v1594_v54, %v1593_v3 }
 0x44d   : > { %2550 = vmatprep.mubr.bf16.mxu1 %v1603_v56 }
 0x44e   : > { %2551 = vmatmul.mubr.bf16.gmra.mrb[60].mxu1 %v1604_v55  ;;  %v1815_v55 = vlaneseq }
 0x450   : > { %v1816_v56 = vshrl.u32 %v1815_v55, 7 }
 0x452   : > { %v1817_v57 = vsub.s32 0, %v1816_v56  ;;  %v1821_v59 = vsub.s32 1, %v1816_v56 }
 0x454   : > { %v3226_v61 = vrot.slane %v1813_v58, %v1817_v57 }
 0x500   : > { %v2540_v12 = vpop.f32.mrb[48].mxu1 }
 0x501   : > { %v1719_v1 = vadd.f32 %v2540_v12, %v2281_v63  ;;  %v1710_v8 = vpop.f32.mrb[49].mxu1 }
 0x502   : > { %v1711_v2 = vadd.f32 %v2281_v63, %v1710_v8  ;;  %v2541_v4 = vpop.f32.mrb[50].mxu1 }
 0x503   : > { %v1722_v15 = vadd.f32 %v2541_v4, %v2281_v63  ;;  %v1713_v42 = vpop.f32.mrb[51].mxu1  ;;  %v1775_v7 = vmax.f32 %v1719_v1, 0.0 }
 0x504   : > { %v1714_v5 = vadd.f32 %v2281_v63, %v1713_v42  ;;  %v1773_v11 = vmax.f32 %v1711_v2, 0.0 }
 0x505   : > { %v1776_v10 = vmax.f32 %v1722_v15, 0.0 }
 0x506   : > { %v1774_v13 = vmax.f32 %v1714_v5, 0.0 }
 0x507   : > { %v1790_v14 = vpack.c.bf16 %v1776_v10, %v1775_v7 }
 0x508   : > { %v1789_v16 = vpack.c.bf16 %v1774_v13, %v1773_v11 }
 0x50a   : > { %1938 = vmatmul.mubr.bf16.vlgmr.msra.gmra.mrb[32].mxu0 %v1789_v16 }
 0x50b   : > { %1947 = vmatprep.mubr.bf16.mxu0 %v2713_v62 }
 0x511   : > { %v2544_v17 = vpop.f32.mrb[52].mxu1 }
 0x512   : > { %v1735_v6 = vadd.f32 %v2544_v17, %v2281_v63  ;;  %v1726_v18 = vpop.f32.mrb[53].mxu1  ;;  %1948 = vmatmul.mubr.bf16.gmra.mrb[36].mxu0 %v1790_v14 }
 0x513   : > { %v1727_v19 = vadd.f32 %v2281_v63, %v1726_v18  ;;  %v2545_v28 = vpop.f32.mrb[54].mxu1  ;;  %1957 = vmatprep.mubr.bf16.mxu0 %v2713_v62 }
 0x514   : > { %v1738_v20 = vadd.f32 %v2545_v28, %v2281_v63  ;;  %v1729_v34 = vpop.f32.mrb[55].mxu1  ;;  %v1779_v22 = vmax.f32 %v1735_v6, 0.0 }
 0x515   : > { %v1730_v21 = vadd.f32 %v2281_v63, %v1729_v34  ;;  %v1777_v24 = vmax.f32 %v1727_v19, 0.0 }
 0x516   : > { %v1780_v23 = vmax.f32 %v1738_v20, 0.0 }
 0x517   : > { %v1778_v26 = vmax.f32 %v1730_v21, 0.0 }
 0x518   : > { %v1792_v27 = vpack.c.bf16 %v1780_v23, %v1779_v22 }
 0x519   : > { %v1791_v25 = vpack.c.bf16 %v1778_v26, %v1777_v24  ;;  %v2548_v30 = vpop.f32.mrb[56].mxu1 }
 0x51a   : > { %v1751_v29 = vadd.f32 %v2548_v30, %v2281_v63  ;;  %v1742_v31 = vpop.f32.mrb[57].mxu1 }
 0x51b   : > { %v1743_v32 = vadd.f32 %v2281_v63, %v1742_v31  ;;  %v2549_v33 = vpop.f32.mrb[58].mxu1  ;;  %1958 = vmatmul.mubr.bf16.gmra.mrb[40].mxu0 %v1791_v25 }
 0x51c   : > { %v1754_v35 = vadd.f32 %v2549_v33, %v2281_v63  ;;  %v1745_v36 = vpop.f32.mrb[59].mxu1  ;;  %1967 = vmatprep.mubr.bf16.mxu0 %v2713_v62  ;;  %v1783_v48 = vmax.f32 %v1751_v29, 0.0 }
 0x51d   : > { %v1746_v37 = vadd.f32 %v2281_v63, %v1745_v36  ;;  %v1781_v53 = vmax.f32 %v1743_v32, 0.0 }
 0x51e   : > { %v1784_v38 = vmax.f32 %v1754_v35, 0.0 }
 0x51f   : > { %v1782_v39 = vmax.f32 %v1746_v37, 0.0 }
 0x520   : > { %v1794_v41 = vpack.c.bf16 %v1784_v38, %v1783_v48 }
 0x521   : > { %v1793_v43 = vpack.c.bf16 %v1782_v39, %v1781_v53  ;;  %v2552_v44 = vpop.f32.mrb[60].mxu1 }
 0x522   : > { %v1767_v46 = vadd.f32 %v2552_v44, %v2281_v63  ;;  %v1758_v47 = vpop.f32.mrb[61].mxu1 }
 0x523   : > { %v1759_v49 = vadd.f32 %v2281_v63, %v1758_v47  ;;  %v2553_v45 = vpop.f32.mrb[62].mxu1  ;;  %1968 = vmatmul.mubr.bf16.gmra.mrb[44].mxu0 %v1792_v27 }
 0x524   : > { %v1770_v40 = vadd.f32 %v2553_v45, %v2281_v63  ;;  %v1761_v50 = vpop.f32.mrb[63].mxu1  ;;  %1977 = vmatprep.mubr.bf16.mxu0 %v2713_v62  ;;  %v1787_v52 = vmax.f32 %v1767_v46, 0.0 }
 0x525   : > { %v1762_v51 = vadd.f32 %v2281_v63, %v1761_v50  ;;  %v1785_v9 = vmax.f32 %v1759_v49, 0.0  ;;  %v3228_v63 = vrot.slane %v1813_v58, %v1821_v59 }
 0x526   : > { %v1788_v0 = vmax.f32 %v1770_v40, 0.0 }
 0x527   : > { %v1786_v60 = vmax.f32 %v1762_v51, 0.0 }
 0x528   : > { %v1796_v3 = vpack.c.bf16 %v1788_v0, %v1787_v52 }
 0x529   : > { %v1795_v54 = vpack.c.bf16 %v1786_v60, %v1785_v9 }
 0x52b   : > { %1978 = vmatmul.mubr.bf16.gmra.mrb[48].mxu0 %v1793_v43 }
 0x52c   : > { %1987 = vmatprep.mubr.bf16.mxu0 %v2713_v62 }
 0x533   : > { %1988 = vmatmul.mubr.bf16.gmra.mrb[52].mxu0 %v1794_v41 }
 0x534   : > { %1997 = vmatprep.mubr.bf16.mxu0 %v2713_v62 }
 0x53b   : > { %1998 = vmatmul.mubr.bf16.gmra.mrb[56].mxu0 %v1795_v54 }
 0x53c   : > { %2007 = vmatprep.mubr.bf16.mxu0 %v2713_v62 }
 0x543   : > { %2008 = vmatmul.mubr.bf16.gmra.mrb[60].mxu0 %v1796_v3 }
 0x5dd   : > { %v1939_v12 = vpop.f32.mrb[32].mxu0 }
 0x5de   : > { %v1940_v1 = vadd.f32 %v1939_v12, %v3226_v61  ;;  %v1941_v8 = vpop.f32.mrb[33].mxu0 }
 0x5df   : > { %v1942_v62 = vadd.f32 %v1941_v8, %v3228_v63  ;;  %v1943_v2 = vpop.f32.mrb[34].mxu0 }
 0x5e0   : > { %v2018_v4 = vmax.f32 %v1940_v1, 0.0  ;;  %v1944_v15 = vadd.f32 %v1943_v2, %v3226_v61  ;;  %v1945_v42 = vpop.f32.mrb[35].mxu0 }
 0x5e1   : > { %v2019_v5 = vmax.f32 %v1942_v62, 0.0  ;;  %v1946_v7 = vadd.f32 %v1945_v42, %v3228_v63 }
 0x5e2   : > { %2050 = vst [vmem:[%s3235_s17] sm:$0xff] %v2018_v4  ;;  %v2020_v10 = vmax.f32 %v1944_v15, 0.0 }
 0x5e3   : > { %2051 = vst [vmem:[%s3235_s17 + $0x8] sm:$0xff] %v2019_v5  ;;  %v2021_v11 = vmax.f32 %v1946_v7, 0.0 }
 0x5e4   : > { %2052 = vst [vmem:[%s3235_s17 + $0x10] sm:$0xff] %v2020_v10 }
 0x5e5   : > { %2053 = vst [vmem:[%s3235_s17 + $0x18] sm:$0xff] %v2021_v11  ;;  %v1949_v13 = vpop.f32.mrb[36].mxu0 }
 0x5e6   : > { %v1950_v14 = vadd.f32 %v1949_v13, %v3226_v61  ;;  %v1951_v16 = vpop.f32.mrb[37].mxu0 }
 0x5e7   : > { %v1952_v17 = vadd.f32 %v1951_v16, %v3228_v63  ;;  %v1953_v6 = vpop.f32.mrb[38].mxu0 }
 0x5e8   : > { %v2022_v18 = vmax.f32 %v1950_v14, 0.0  ;;  %v1954_v19 = vadd.f32 %v1953_v6, %v3226_v61  ;;  %v1955_v28 = vpop.f32.mrb[39].mxu0 }
 0x5e9   : > { %v2023_v20 = vmax.f32 %v1952_v17, 0.0  ;;  %v1956_v34 = vadd.f32 %v1955_v28, %v3228_v63 }
 0x5ea   : > { %2054 = vst [vmem:[%s3235_s17 + $0x20] sm:$0xff] %v2022_v18  ;;  %v2024_v21 = vmax.f32 %v1954_v19, 0.0 }
 0x5eb   : > { %2055 = vst [vmem:[%s3235_s17 + $0x28] sm:$0xff] %v2023_v20  ;;  %v2025_v22 = vmax.f32 %v1956_v34, 0.0 }
 0x5ec   : > { %2056 = vst [vmem:[%s3235_s17 + $0x30] sm:$0xff] %v2024_v21 }
 0x5ed   : > { %2057 = vst [vmem:[%s3235_s17 + $0x38] sm:$0xff] %v2025_v22 }
 0x5ee   : > { %v1959_v23 = vpop.f32.mrb[40].mxu0 }
 0x5ef   : > { %v1960_v24 = vadd.f32 %v1959_v23, %v3226_v61  ;;  %v1961_v26 = vpop.f32.mrb[41].mxu0 }
 0x5f0   : > { %v1962_v27 = vadd.f32 %v1961_v26, %v3228_v63  ;;  %v1963_v25 = vpop.f32.mrb[42].mxu0 }
 0x5f1   : > { %v2026_v30 = vmax.f32 %v1960_v24, 0.0  ;;  %v1964_v29 = vadd.f32 %v1963_v25, %v3226_v61  ;;  %v1965_v31 = vpop.f32.mrb[43].mxu0 }
 0x5f2   : > { %v2027_v32 = vmax.f32 %v1962_v27, 0.0  ;;  %v1966_v33 = vadd.f32 %v1965_v31, %v3228_v63 }
 0x5f3   : > { %2058 = vst [vmem:[%s3235_s17 + $0x40] sm:$0xff] %v2026_v30  ;;  %v2028_v35 = vmax.f32 %v1964_v29, 0.0 }
 0x5f4   : > { %2059 = vst [vmem:[%s3235_s17 + $0x48] sm:$0xff] %v2027_v32  ;;  %v2029_v36 = vmax.f32 %v1966_v33, 0.0 }
 0x5f5   : > { %2060 = vst [vmem:[%s3235_s17 + $0x50] sm:$0xff] %v2028_v35 }
 0x5f6   : > { %2061 = vst [vmem:[%s3235_s17 + $0x58] sm:$0xff] %v2029_v36  ;;  %v1969_v37 = vpop.f32.mrb[44].mxu0 }
 0x5f7   : > { %v1970_v48 = vadd.f32 %v1969_v37, %v3226_v61  ;;  %v1971_v38 = vpop.f32.mrb[45].mxu0 }
 0x5f8   : > { %v1972_v53 = vadd.f32 %v1971_v38, %v3228_v63  ;;  %v1973_v39 = vpop.f32.mrb[46].mxu0 }
 0x5f9   : > { %v2030_v41 = vmax.f32 %v1970_v48, 0.0  ;;  %v1974_v43 = vadd.f32 %v1973_v39, %v3226_v61  ;;  %v1975_v44 = vpop.f32.mrb[47].mxu0 }
 0x5fa   : > { %v2031_v46 = vmax.f32 %v1972_v53, 0.0  ;;  %v1976_v47 = vadd.f32 %v1975_v44, %v3228_v63 }
 0x5fb   : > { %2062 = vst [vmem:[%s3235_s17 + $0x60] sm:$0xff] %v2030_v41  ;;  %v2032_v49 = vmax.f32 %v1974_v43, 0.0 }
 0x5fc   : > { %2063 = vst [vmem:[%s3235_s17 + $0x68] sm:$0xff] %v2031_v46  ;;  %v2033_v45 = vmax.f32 %v1976_v47, 0.0 }
 0x5fd   : > { %2064 = vst [vmem:[%s3235_s17 + $0x70] sm:$0xff] %v2032_v49 }
 0x5fe   : > { %2065 = vst [vmem:[%s3235_s17 + $0x78] sm:$0xff] %v2033_v45  ;;  %v1979_v40 = vpop.f32.mrb[48].mxu0 }
 0x5ff   : > { %v1980_v50 = vadd.f32 %v1979_v40, %v3226_v61  ;;  %v1981_v51 = vpop.f32.mrb[49].mxu0 }
 0x600   : > { %v1982_v52 = vadd.f32 %v1981_v51, %v3228_v63  ;;  %v1983_v0 = vpop.f32.mrb[50].mxu0 }
 0x601   : > { %v2034_v9 = vmax.f32 %v1980_v50, 0.0  ;;  %v1984_v60 = vadd.f32 %v1983_v0, %v3226_v61  ;;  %v1985_v3 = vpop.f32.mrb[51].mxu0 }
 0x602   : > { %v2035_v54 = vmax.f32 %v1982_v52, 0.0  ;;  %v1986_v55 = vadd.f32 %v1985_v3, %v3228_v63 }
 0x603   : > { %2066 = vst [vmem:[%s3235_s17 + $0x80] sm:$0xff] %v2034_v9  ;;  %v2036_v56 = vmax.f32 %v1984_v60, 0.0 }
 0x604   : > { %2067 = vst [vmem:[%s3235_s17 + $0x88] sm:$0xff] %v2035_v54  ;;  %v2037_v57 = vmax.f32 %v1986_v55, 0.0 }
 0x605   : > { %2068 = vst [vmem:[%s3235_s17 + $0x90] sm:$0xff] %v2036_v56 }
 0x606   : > { %2069 = vst [vmem:[%s3235_s17 + $0x98] sm:$0xff] %v2037_v57  ;;  %v1989_v58 = vpop.f32.mrb[52].mxu0 }
 0x607   : > { %v1990_v59 = vadd.f32 %v1989_v58, %v3226_v61  ;;  %v1991_v12 = vpop.f32.mrb[53].mxu0 }
 0x608   : > { %v1992_v1 = vadd.f32 %v1991_v12, %v3228_v63  ;;  %v1993_v8 = vpop.f32.mrb[54].mxu0 }
 0x609   : > { %v2038_v62 = vmax.f32 %v1990_v59, 0.0  ;;  %v1994_v2 = vadd.f32 %v1993_v8, %v3226_v61  ;;  %v1995_v4 = vpop.f32.mrb[55].mxu0 }
 0x60a   : > { %v2039_v15 = vmax.f32 %v1992_v1, 0.0  ;;  %v1996_v42 = vadd.f32 %v1995_v4, %v3228_v63 }
 0x60b   : > { %2070 = vst [vmem:[%s3235_s17 + $0xa0] sm:$0xff] %v2038_v62  ;;  %v2040_v5 = vmax.f32 %v1994_v2, 0.0 }
 0x60c   : > { %2071 = vst [vmem:[%s3235_s17 + $0xa8] sm:$0xff] %v2039_v15  ;;  %v2041_v7 = vmax.f32 %v1996_v42, 0.0 }
 0x60d   : > { %2072 = vst [vmem:[%s3235_s17 + $0xb0] sm:$0xff] %v2040_v5 }
 0x60e   : > { %2073 = vst [vmem:[%s3235_s17 + $0xb8] sm:$0xff] %v2041_v7  ;;  %v1999_v10 = vpop.f32.mrb[56].mxu0 }
 0x60f   : > { %v2000_v11 = vadd.f32 %v1999_v10, %v3226_v61  ;;  %v2001_v13 = vpop.f32.mrb[57].mxu0 }
 0x610   : > { %v2002_v14 = vadd.f32 %v2001_v13, %v3228_v63  ;;  %v2003_v16 = vpop.f32.mrb[58].mxu0 }
 0x611   : > { %v2042_v17 = vmax.f32 %v2000_v11, 0.0  ;;  %v2004_v6 = vadd.f32 %v2003_v16, %v3226_v61  ;;  %v2005_v18 = vpop.f32.mrb[59].mxu0 }
 0x612   : > { %v2043_v19 = vmax.f32 %v2002_v14, 0.0  ;;  %v2006_v28 = vadd.f32 %v2005_v18, %v3228_v63 }
 0x613   : > { %2074 = vst [vmem:[%s3235_s17 + $0xc0] sm:$0xff] %v2042_v17  ;;  %v2044_v20 = vmax.f32 %v2004_v6, 0.0 }
 0x614   : > { %2075 = vst [vmem:[%s3235_s17 + $0xc8] sm:$0xff] %v2043_v19  ;;  %v2045_v34 = vmax.f32 %v2006_v28, 0.0 }
 0x615   : > { %2076 = vst [vmem:[%s3235_s17 + $0xd0] sm:$0xff] %v2044_v20 }
 0x616   : > { %2077 = vst [vmem:[%s3235_s17 + $0xd8] sm:$0xff] %v2045_v34  ;;  %v2009_v21 = vpop.f32.mrb[60].mxu0 }
 0x617   : > { %v2010_v22 = vadd.f32 %v2009_v21, %v3226_v61  ;;  %v2011_v23 = vpop.f32.mrb[61].mxu0 }
 0x618   : > { %v2012_v24 = vadd.f32 %v2011_v23, %v3228_v63  ;;  %v2013_v26 = vpop.f32.mrb[62].mxu0 }
 0x619   : > { %v2046_v27 = vmax.f32 %v2010_v22, 0.0  ;;  %v2014_v25 = vadd.f32 %v2013_v26, %v3226_v61  ;;  %v2015_v30 = vpop.f32.mrb[63].mxu0 }
 0x61a   : > { %v2047_v29 = vmax.f32 %v2012_v24, 0.0  ;;  %v2016_v31 = vadd.f32 %v2015_v30, %v3228_v63 }
 0x61b   : > { %2078 = vst [vmem:[%s3235_s17 + $0xe0] sm:$0xff] %v2046_v27  ;;  %v2048_v32 = vmax.f32 %v2014_v25, 0.0 }
 0x61c   : > { %2079 = vst [vmem:[%s3235_s17 + $0xe8] sm:$0xff] %v2047_v29  ;;  %v2049_v33 = vmax.f32 %v2016_v31, 0.0 }
 0x61d   : > { %2080 = vst [vmem:[%s3235_s17 + $0xf0] sm:$0xff] %v2048_v32 }
 0x61e   : > { %2081 = vst [vmem:[%s3235_s17 + $0xf8] sm:$0xff] %v2049_v33 }
 0x61f PF: > { %s26_s18 = sadd.s32 1, %s2710_s18  }
 0x620   : > { %p23_p4 = scmp.ge.s32.totalorder %s26_s18, 4  }
 0x622   :  { %25 = sbr.rel (!%p23_p4) target bundleno = 1 (0x1), region = 121 }

</bundles_post_ra>
